<compile_context>
chip_gen: v7x
topology: tpu7x:2x2x1
jax: 0.10.0
libtpu: 0.0.40
codegen_flags: <defaults>
</compile_context>

<pallas_src>
import jax
import jax.numpy as jnp
from jax.experimental import pallas as pl
from jax.experimental.pallas import tpu as pltpu


def _round_up(x, m):
    return (x + m - 1) // m * m


# ----------------------------------------------------------------------------
# Fused kernel (one row-tile per grid step):
#   x  = f_img @ W_img
#      + sum_j (lift[:, j*D:(j+1)*D] @ W_joint) @ W_pose[j*D4:(j+1)*D4, :]
#      + b_total                                  (all embed-dim biases folded)
#   xn = LayerNorm(x)                             (f32, VPU/EUP)
#   h  = ReLU(xn @ W_f1 + b1)                     (MXU)
#   o  = h @ W_f2 + b2                            (MXU)
# ----------------------------------------------------------------------------
def _fused_forward_kernel(
    fimg_ref, lift_ref,
    wimg_ref, wj_ref, wp_ref, bias_ref,
    ln_g_ref, ln_b_ref,
    w1_ref, b1_ref,
    w2_ref, b2_ref,
    o_ref,
):
    cd = wimg_ref.dtype
    emb = wj_ref.shape[0]          # backbone / embed feature dim per joint
    d_joint = wj_ref.shape[1]      # embed_dim // 4
    num_joint = lift_ref.shape[1] // emb

    # proj_img
    x = jnp.dot(fimg_ref[...], wimg_ref[...], preferred_element_type=jnp.float32)

    # proj_joint -> proj_pose, two stages kept inside the kernel (no offline
    # weight folding).  Per-joint slices are static, 128-aligned lane slices.
    for j in range(num_joint):
        jf = jnp.dot(
            lift_ref[:, j * emb:(j + 1) * emb], wj_ref[...],
            preferred_element_type=jnp.float32)
        x = x + jnp.dot(
            jf.astype(cd), wp_ref[j * d_joint:(j + 1) * d_joint, :],
            preferred_element_type=jnp.float32)

    # single folded bias: b_img + b_pose + b_joint @ W_pose
    x = x + bias_ref[...]

    # fusing[0]: LayerNorm(embed_dim), eps = 1e-5, biased variance (PyTorch).
    mu = jnp.mean(x, axis=-1, keepdims=True)
    var = jnp.mean((x - mu) ** 2, axis=-1, keepdims=True)
    xn = (x - mu) * jax.lax.rsqrt(var + 1e-5)
    xn = xn * ln_g_ref[...] + ln_b_ref[...]

    # fusing[1..3]: Linear -> ReLU -> Linear
    h = jnp.maximum(
        jnp.dot(xn.astype(cd), w1_ref[...],
                preferred_element_type=jnp.float32) + b1_ref[...],
        0.0,
    )
    o_ref[...] = (
        jnp.dot(h.astype(cd), w2_ref[...],
                preferred_element_type=jnp.float32) + b2_ref[...]
    )


def fuse_pallas(
    f_img_rows, lift_rows,
    w_img, w_joint, w_pose, bias,
    ln_g, ln_b,
    w_f1, b_f1,
    w_f2, b_f2,
    *, row_tile=256, compute_dtype=jnp.bfloat16,
):
    N, d_img = f_img_rows.shape
    k_pose = lift_rows.shape[1]
    emb, d_joint = w_joint.shape
    D = w_img.shape[1]
    num_joint = k_pose // emb

    cd = compute_dtype
    # Cast before pad (halves the pad copy); weight casts are normally already
    # done once in prepare_fused_params (these are no-ops then).
    f_img_rows = f_img_rows.astype(cd)
    lift_rows = lift_rows.astype(cd)
    w_img = w_img.astype(cd)
    w_joint = w_joint.astype(cd)
    w_pose = w_pose.astype(cd)
    w_f1 = w_f1.astype(cd)
    w_f2 = w_f2.astype(cd)
    # Biases / LayerNorm params stay f32 (tiny; elementwise path is f32).

    # MXU-shaped row tile; pad the row axis instead of requiring divisibility.
    # Guarantee >= 2 grid steps when possible so dimension_semantics=
    # ("parallel",) can shard rows across both TensorCores on v7x.
    row_tile = int(max(8, min(row_tile, _round_up(N, 8))))
    if _round_up(N, row_tile) // row_tile < 2 and N > 8:
        row_tile = _round_up((N + 1) // 2, 8)
    n_pad = _round_up(N, row_tile)
    if n_pad != N:
        f_img_rows = jnp.pad(f_img_rows, ((0, n_pad - N), (0, 0)))
        lift_rows = jnp.pad(lift_rows, ((0, n_pad - N), (0, 0)))

    itemsize = jnp.dtype(cd).itemsize
    weight_elems = d_img * D + emb * d_joint + num_joint * d_joint * D + 2 * D * D
    flops = int(2 * n_pad * (d_img * D
                             + num_joint * (emb * d_joint + d_joint * D)
                             + 2 * D * D))
    bytes_accessed = int(
        n_pad * (d_img + k_pose) * itemsize        # activation inputs
        + weight_elems * itemsize                  # weight slabs
        + 5 * D * 4                                # biases + LN params (f32)
        + n_pad * D * 4                            # f32 output
    )
    cost = pl.CostEstimate(flops=flops, transcendentals=int(n_pad),
                           bytes_accessed=bytes_accessed)

    # VMEM budget: double-buffered activation tiles + double-buffered weight
    # slabs (small after the un-fold) + f32 intermediates; generous margin.
    vmem_needed = (
        2 * row_tile * (d_img + k_pose) * itemsize     # input tiles x2 buffers
        + 2 * (weight_elems * itemsize + 5 * D * 4)    # weights x2 buffers
        + 2 * row_tile * D * 4                         # output tile x2 buffers
        + 4 * row_tile * D * 4                         # f32 temporaries
    )
    vmem_limit = int(min(56 * 1024 * 1024,
                         max(32 * 1024 * 1024, int(vmem_needed * 1.3))))

    wconst = lambda shape: pl.BlockSpec(shape, lambda i: (0, 0))

    out = pl.pallas_call(
        _fused_forward_kernel,
        out_shape=jax.ShapeDtypeStruct((n_pad, D), jnp.float32),
        grid=(n_pad // row_tile,),
        in_specs=[
            pl.BlockSpec((row_tile, d_img), lambda i: (i, 0)),
            pl.BlockSpec((row_tile, k_pose), lambda i: (i, 0)),
            wconst((d_img, D)),
            wconst((emb, d_joint)),
            wconst((num_joint * d_joint, D)),
            wconst((1, D)),
            wconst((1, D)),
            wconst((1, D)),
            wconst((D, D)),
            wconst((1, D)),
            wconst((D, D)),
            wconst((1, D)),
        ],
        out_specs=pl.BlockSpec((row_tile, D), lambda i: (i, 0)),
        compiler_params=pltpu.CompilerParams(
            dimension_semantics=("parallel",),
            vmem_limit_bytes=vmem_limit,
        ),
        cost_estimate=cost,
    )(
        f_img_rows, lift_rows,
        w_img, w_joint, w_pose, bias,
        ln_g, ln_b,
        w_f1, b_f1,
        w_f2, b_f2,
    )
    return out[:N]


# ----------------------------------------------------------------------------
# One-time weight preparation (hoisted out of the per-step forward):
#   * fold all embed-dim biases into one vector:
#       b_total = b_img + b_pose + sum_j b_joint @ W_pose[j]   (exact, f32)
#   * cast weight slabs to bf16 once.
# ----------------------------------------------------------------------------
def prepare_fused_params(params, num_joint, compute_dtype=jnp.bfloat16):
    D = params["w_img"].shape[1]
    D4 = params["w_joint"].shape[1]
    wp3 = params["w_pose"].reshape(num_joint, D4, D)
    bias = (params["b_img"] + params["b_pose"]
            + jnp.einsum("e,jef->f", params["b_joint"][0], wp3)[None, :])
    cd = compute_dtype
    return dict(
        w_img=params["w_img"].astype(cd),
        w_joint=params["w_joint"].astype(cd),
        w_pose=params["w_pose"].astype(cd),
        bias=bias.astype(jnp.float32),
        ln_g=params["ln_g"], ln_b=params["ln_b"],
        w_f1=params["w_f1"].astype(cd), b_f1=params["b_f1"],
        w_f2=params["w_f2"].astype(cd), b_f2=params["b_f2"],
        w_lift=params["w_lift"],
    )


# ----------------------------------------------------------------------------
# Model wrapper (glue in plain JAX)
# ----------------------------------------------------------------------------
def init_params(key, *, embed_dim, num_joint, d_img=2048):
    D, D4 = embed_dim, embed_dim // 4
    keys = jax.random.split(key, 11)
    s = 0.02

    def lin(kw, kb, fan_in, fan_out):
        return (jax.random.normal(kw, (fan_in, fan_out), jnp.float32) * s,
                jax.random.normal(kb, (1, fan_out), jnp.float32) * s)

    w_img, b_img = lin(keys[0], keys[1], d_img, D)
    w_joint, b_joint = lin(keys[2], keys[3], D, D4)
    w_pose, b_pose = lin(keys[4], keys[5], num_joint * D4, D)
    w_f1, b_f1 = lin(keys[6], keys[7], D, D)
    w_f2, b_f2 = lin(keys[8], keys[9], D, D)
    # backbone stub parameters (plain JAX, see TODO below)
    w_lift = jax.random.normal(keys[10], (2, D), jnp.float32) * s
    return dict(
        w_img=w_img, b_img=b_img,
        w_joint=w_joint, b_joint=b_joint,
        w_pose=w_pose, b_pose=b_pose,
        ln_g=jnp.ones((1, D), jnp.float32),
        ln_b=jnp.zeros((1, D), jnp.float32),
        w_f1=w_f1, b_f1=b_f1,
        w_f2=w_f2, b_f2=b_f2,
        w_lift=w_lift,
    )


def model_forward(prep, f_img, pose_2d, *, row_tile=256):
    """f_img: [B, T, 2048], pose_2d: [B, T, J, 2] -> fused feature [B, T, D]."""
    B, T, d_img = f_img.shape
    J = pose_2d.shape[2]
    D = prep["w_img"].shape[1]

    # TODO(synk): DSTformer.get_representation is an external pretrained
    # backbone (definition not provided); stubbed with a deterministic
    # per-joint linear lift 2 -> embed_dim in plain JAX (emitted in bf16).
    lift3d = jnp.einsum("btjc,cd->btjd", pose_2d, prep["w_lift"]).astype(jnp.bfloat16)

    feat = fuse_pallas(
        f_img.reshape(B * T, d_img).astype(jnp.bfloat16),
        lift3d.reshape(B * T, J * D),
        prep["w_img"], prep["w_joint"], prep["w_pose"], prep["bias"],
        prep["ln_g"], prep["ln_b"],
        prep["w_f1"], prep["b_f1"],
        prep["w_f2"], prep["b_f2"],
        row_tile=row_tile,
    )
    feat = feat.reshape(B, T, D)

    # TODO(synk): GMM mask_transformer + SMPL regression head (smpl_output_global,
    # mask_ids, mem, pred_global) are external modules with no provided source;
    # the fused feature that feeds them is returned instead.
    return feat


# ----------------------------------------------------------------------------
# References
# ----------------------------------------------------------------------------
def _bf(a):
    """Round to bf16 and back (replicates the kernel's input/weight cast)."""
    return a.astype(jnp.bfloat16).astype(jnp.float32)


def model_forward_ref_matched(params, f_img, pose_2d):
    """Same numerics as the kernel: two-stage pose path with the intermediate
    bf16 rounding, folded bias vector, f32 accumulation / LayerNorm."""
    B, T, d_img = f_img.shape
    J = pose_2d.shape[2]
    D = params["w_img"].shape[1]
    D4 = params["w_joint"].shape[1]

    lift = jnp.einsum("btjc,cd->btjd", pose_2d, params["w_lift"])
    lift_b = _bf(lift).reshape(B * T, J, D)

    x = _bf(f_img.reshape(B * T, d_img)) @ _bf(params["w_img"])
    wj = _bf(params["w_joint"])
    wp = _bf(params["w_pose"])
    for j in range(J):
        jf = lift_b[:, j, :] @ wj
        x = x + _bf(jf) @ wp[j * D4:(j + 1) * D4, :]

    wp3 = params["w_pose"].reshape(J, D4, D)
    bias = (params["b_img"] + params["b_pose"]
            + jnp.einsum("e,jef->f", params["b_joint"][0], wp3)[None, :])
    x = x + bias

    mu = jnp.mean(x, axis=-1, keepdims=True)
    var = jnp.mean((x - mu) ** 2, axis=-1, keepdims=True)
    xn = (x - mu) * jax.lax.rsqrt(var + 1e-5)
    xn = xn * params["ln_g"] + params["ln_b"]
    h = jnp.maximum(_bf(xn) @ _bf(params["w_f1"]) + params["b_f1"], 0.0)
    out = _bf(h) @ _bf(params["w_f2"]) + params["b_f2"]
    return out.reshape(B, T, D)


def model_forward_ref_f32(params, f_img, pose_2d):
    """Pure-f32 reference mirroring the PyTorch module semantics."""
    B, T, _ = f_img.shape
    J = pose_2d.shape[2]
    lift3d = jnp.einsum("btjc,cd->btjd", pose_2d, params["w_lift"])
    joint = jnp.einsum("btjd,de->btje", lift3d, params["w_joint"]) + params["b_joint"][0]
    pose_feat = joint.reshape(B, T, -1) @ params["w_pose"] + params["b_pose"][0]
    img_feat = f_img @ params["w_img"] + params["b_img"][0]
    x = img_feat + pose_feat
    mu = jnp.mean(x, axis=-1, keepdims=True)
    var = jnp.mean((x - mu) ** 2, axis=-1, keepdims=True)
    xn = (x - mu) * jax.lax.rsqrt(var + 1e-5)
    xn = xn * params["ln_g"][0] + params["ln_b"][0]
    h = jnp.maximum(xn @ params["w_f1"] + params["b_f1"][0], 0.0)
    return h @ params["w_f2"] + params["b_f2"][0]


if __name__ == "__main__":
    # Small shapes consistent with the module's forward
    B, T = 2, 8
    NUM_JOINT = 17
    EMBED_DIM = 128   # module default is 512; scaled down, same structure
    D_IMG = 2048      # fixed by proj_img = nn.Linear(2048, embed_dim)

    key = jax.random.PRNGKey(0)
    k_p, k_img, k_pose = jax.random.split(key, 3)

    params = init_params(k_p, embed_dim=EMBED_DIM, num_joint=NUM_JOINT, d_img=D_IMG)
    # One-time weight preparation (hoisted out of the per-step forward).
    prep = prepare_fused_params(params, NUM_JOINT)

    f_img = jax.random.normal(k_img, (B, T, D_IMG), jnp.float32)
    pose_2d = jax.random.normal(k_pose, (B, T, NUM_JOINT, 2), jnp.float32)

    out = jax.block_until_ready(model_forward(prep, f_img, pose_2d))
    assert out.shape == (B, T, EMBED_DIM)

    # Tight check vs. a reference with identical numerics (bf16 operands,
    # two-stage pose path, folded bias, f32 accumulation).
    ref_m = jax.block_until_ready(model_forward_ref_matched(params, f_img, pose_2d))
    assert jnp.allclose(out, ref_m, atol=2e-3, rtol=2e-3), float(
        jnp.max(jnp.abs(out - ref_m)))

    # Looser check vs. the pure-f32 reference (validates the bias folding and
    # bf16 compute against the original module semantics).
    ref_f = jax.block_until_ready(model_forward_ref_f32(params, f_img, pose_2d))
    assert jnp.allclose(out, ref_f, atol=5e-2, rtol=5e-2), float(
        jnp.max(jnp.abs(out - ref_f)))

    print("KERNEL_OK")
</pallas_src>

<mosaic_0001>
module attributes {stable_mosaic.version = 11 : i64} {
  func.func @_fused_forward_kernel(%arg0: i32, %arg1: memref<8x2048xbf16, #tpu.memory_space<vmem>>, %arg2: memref<8x2176xbf16, #tpu.memory_space<vmem>>, %arg3: memref<2048x128xbf16, #tpu.memory_space<vmem>>, %arg4: memref<128x32xbf16, #tpu.memory_space<vmem>>, %arg5: memref<544x128xbf16, #tpu.memory_space<vmem>>, %arg6: memref<1x128xf32, #tpu.memory_space<vmem>>, %arg7: memref<1x128xf32, #tpu.memory_space<vmem>>, %arg8: memref<1x128xf32, #tpu.memory_space<vmem>>, %arg9: memref<128x128xbf16, #tpu.memory_space<vmem>>, %arg10: memref<1x128xf32, #tpu.memory_space<vmem>>, %arg11: memref<128x128xbf16, #tpu.memory_space<vmem>>, %arg12: memref<1x128xf32, #tpu.memory_space<vmem>>, %arg13: memref<8x128xf32, #tpu.memory_space<vmem>>) attributes {dimension_semantics = [#tpu.dimension_semantics<parallel>], iteration_bounds = array<i64: 2>, scalar_prefetch = 0 : i64, scratch_operands = 0 : i64, tpu.core_type = #tpu.core_type<tc>, window_params = [{transform_indices = @transform_0, window_bounds = array<i64: 8, 2048>}, {transform_indices = @transform_1, window_bounds = array<i64: 8, 2176>}, {pipeline_mode = #tpu.pipeline_mode<synchronous>, transform_indices = @transform_2, window_bounds = array<i64: 2048, 128>}, {pipeline_mode = #tpu.pipeline_mode<synchronous>, transform_indices = @transform_3, window_bounds = array<i64: 128, 32>}, {pipeline_mode = #tpu.pipeline_mode<synchronous>, transform_indices = @transform_4, window_bounds = array<i64: 544, 128>}, {pipeline_mode = #tpu.pipeline_mode<synchronous>, transform_indices = @transform_5, window_bounds = array<i64: 1, 128>}, {pipeline_mode = #tpu.pipeline_mode<synchronous>, transform_indices = @transform_6, window_bounds = array<i64: 1, 128>}, {pipeline_mode = #tpu.pipeline_mode<synchronous>, transform_indices = @transform_7, window_bounds = array<i64: 1, 128>}, {pipeline_mode = #tpu.pipeline_mode<synchronous>, transform_indices = @transform_8, window_bounds = array<i64: 128, 128>}, {pipeline_mode = #tpu.pipeline_mode<synchronous>, transform_indices = @transform_9, window_bounds = array<i64: 1, 128>}, {pipeline_mode = #tpu.pipeline_mode<synchronous>, transform_indices = @transform_10, window_bounds = array<i64: 128, 128>}, {pipeline_mode = #tpu.pipeline_mode<synchronous>, transform_indices = @transform_11, window_bounds = array<i64: 1, 128>}, {transform_indices = @transform_12, window_bounds = array<i64: 8, 128>}]} {
    %c0 = arith.constant 0 : index
    %c0_0 = arith.constant 0 : index
    %0 = vector.load %arg1[%c0, %c0_0] : memref<8x2048xbf16, #tpu.memory_space<vmem>>, vector<8x2048xbf16>
    %c0_1 = arith.constant 0 : index
    %c0_2 = arith.constant 0 : index
    %1 = vector.load %arg3[%c0_1, %c0_2] : memref<2048x128xbf16, #tpu.memory_space<vmem>>, vector<2048x128xbf16>
    %cst = arith.constant dense<0.000000e+00> : vector<8x128xf32>
    %2 = tpu.matmul %0, %1, %cst {dimension_numbers = #tpu.dot_dimension_numbers<[1], [0], [0], [1], [0, 0, 1, 1], [], []>} : vector<8x2048xbf16>, vector<2048x128xbf16>, vector<8x128xf32> -> vector<8x128xf32>
    %c0_3 = arith.constant 0 : index
    %c0_4 = arith.constant 0 : index
    %3 = vector.load %arg2[%c0_3, %c0_4] : memref<8x2176xbf16, #tpu.memory_space<vmem>>, vector<8x128xbf16>
    %c0_5 = arith.constant 0 : index
    %c0_6 = arith.constant 0 : index
    %4 = vector.load %arg4[%c0_5, %c0_6] : memref<128x32xbf16, #tpu.memory_space<vmem>>, vector<128x32xbf16>
    %cst_7 = arith.constant dense<0.000000e+00> : vector<8x32xf32>
    %5 = tpu.matmul %3, %4, %cst_7 {dimension_numbers = #tpu.dot_dimension_numbers<[1], [0], [0], [1], [0, 0, 1, 1], [], []>} : vector<8x128xbf16>, vector<128x32xbf16>, vector<8x32xf32> -> vector<8x32xf32>
    %6 = arith.truncf %5 : vector<8x32xf32> to vector<8x32xbf16>
    %c0_8 = arith.constant 0 : index
    %c0_9 = arith.constant 0 : index
    %7 = vector.load %arg5[%c0_8, %c0_9] : memref<544x128xbf16, #tpu.memory_space<vmem>>, vector<32x128xbf16>
    %cst_10 = arith.constant dense<0.000000e+00> : vector<8x128xf32>
    %8 = tpu.matmul %6, %7, %cst_10 {dimension_numbers = #tpu.dot_dimension_numbers<[1], [0], [0], [1], [0, 0, 1, 1], [], []>} : vector<8x32xbf16>, vector<32x128xbf16>, vector<8x128xf32> -> vector<8x128xf32>
    %9 = arith.addf %2, %8 : vector<8x128xf32>
    %c0_11 = arith.constant 0 : index
    %c128 = arith.constant 128 : index
    %10 = vector.load %arg2[%c0_11, %c128] : memref<8x2176xbf16, #tpu.memory_space<vmem>>, vector<8x128xbf16>
    %c0_12 = arith.constant 0 : index
    %c0_13 = arith.constant 0 : index
    %11 = vector.load %arg4[%c0_12, %c0_13] : memref<128x32xbf16, #tpu.memory_space<vmem>>, vector<128x32xbf16>
    %cst_14 = arith.constant dense<0.000000e+00> : vector<8x32xf32>
    %12 = tpu.matmul %10, %11, %cst_14 {dimension_numbers = #tpu.dot_dimension_numbers<[1], [0], [0], [1], [0, 0, 1, 1], [], []>} : vector<8x128xbf16>, vector<128x32xbf16>, vector<8x32xf32> -> vector<8x32xf32>
    %13 = arith.truncf %12 : vector<8x32xf32> to vector<8x32xbf16>
    %c32 = arith.constant 32 : index
    %c0_15 = arith.constant 0 : index
    %14 = vector.load %arg5[%c32, %c0_15] : memref<544x128xbf16, #tpu.memory_space<vmem>>, vector<32x128xbf16>
    %cst_16 = arith.constant dense<0.000000e+00> : vector<8x128xf32>
    %15 = tpu.matmul %13, %14, %cst_16 {dimension_numbers = #tpu.dot_dimension_numbers<[1], [0], [0], [1], [0, 0, 1, 1], [], []>} : vector<8x32xbf16>, vector<32x128xbf16>, vector<8x128xf32> -> vector<8x128xf32>
    %16 = arith.addf %9, %15 : vector<8x128xf32>
    %c0_17 = arith.constant 0 : index
    %c256 = arith.constant 256 : index
    %17 = vector.load %arg2[%c0_17, %c256] : memref<8x2176xbf16, #tpu.memory_space<vmem>>, vector<8x128xbf16>
    %c0_18 = arith.constant 0 : index
    %c0_19 = arith.constant 0 : index
    %18 = vector.load %arg4[%c0_18, %c0_19] : memref<128x32xbf16, #tpu.memory_space<vmem>>, vector<128x32xbf16>
    %cst_20 = arith.constant dense<0.000000e+00> : vector<8x32xf32>
    %19 = tpu.matmul %17, %18, %cst_20 {dimension_numbers = #tpu.dot_dimension_numbers<[1], [0], [0], [1], [0, 0, 1, 1], [], []>} : vector<8x128xbf16>, vector<128x32xbf16>, vector<8x32xf32> -> vector<8x32xf32>
    %20 = arith.truncf %19 : vector<8x32xf32> to vector<8x32xbf16>
    %c64 = arith.constant 64 : index
    %c0_21 = arith.constant 0 : index
    %21 = vector.load %arg5[%c64, %c0_21] : memref<544x128xbf16, #tpu.memory_space<vmem>>, vector<32x128xbf16>
    %cst_22 = arith.constant dense<0.000000e+00> : vector<8x128xf32>
    %22 = tpu.matmul %20, %21, %cst_22 {dimension_numbers = #tpu.dot_dimension_numbers<[1], [0], [0], [1], [0, 0, 1, 1], [], []>} : vector<8x32xbf16>, vector<32x128xbf16>, vector<8x128xf32> -> vector<8x128xf32>
    %23 = arith.addf %16, %22 : vector<8x128xf32>
    %c0_23 = arith.constant 0 : index
    %c384 = arith.constant 384 : index
    %24 = vector.load %arg2[%c0_23, %c384] : memref<8x2176xbf16, #tpu.memory_space<vmem>>, vector<8x128xbf16>
    %c0_24 = arith.constant 0 : index
    %c0_25 = arith.constant 0 : index
    %25 = vector.load %arg4[%c0_24, %c0_25] : memref<128x32xbf16, #tpu.memory_space<vmem>>, vector<128x32xbf16>
    %cst_26 = arith.constant dense<0.000000e+00> : vector<8x32xf32>
    %26 = tpu.matmul %24, %25, %cst_26 {dimension_numbers = #tpu.dot_dimension_numbers<[1], [0], [0], [1], [0, 0, 1, 1], [], []>} : vector<8x128xbf16>, vector<128x32xbf16>, vector<8x32xf32> -> vector<8x32xf32>
    %27 = arith.truncf %26 : vector<8x32xf32> to vector<8x32xbf16>
    %c96 = arith.constant 96 : index
    %c0_27 = arith.constant 0 : index
    %28 = vector.load %arg5[%c96, %c0_27] : memref<544x128xbf16, #tpu.memory_space<vmem>>, vector<32x128xbf16>
    %cst_28 = arith.constant dense<0.000000e+00> : vector<8x128xf32>
    %29 = tpu.matmul %27, %28, %cst_28 {dimension_numbers = #tpu.dot_dimension_numbers<[1], [0], [0], [1], [0, 0, 1, 1], [], []>} : vector<8x32xbf16>, vector<32x128xbf16>, vector<8x128xf32> -> vector<8x128xf32>
    %30 = arith.addf %23, %29 : vector<8x128xf32>
    %c0_29 = arith.constant 0 : index
    %c512 = arith.constant 512 : index
    %31 = vector.load %arg2[%c0_29, %c512] : memref<8x2176xbf16, #tpu.memory_space<vmem>>, vector<8x128xbf16>
    %c0_30 = arith.constant 0 : index
    %c0_31 = arith.constant 0 : index
    %32 = vector.load %arg4[%c0_30, %c0_31] : memref<128x32xbf16, #tpu.memory_space<vmem>>, vector<128x32xbf16>
    %cst_32 = arith.constant dense<0.000000e+00> : vector<8x32xf32>
    %33 = tpu.matmul %31, %32, %cst_32 {dimension_numbers = #tpu.dot_dimension_numbers<[1], [0], [0], [1], [0, 0, 1, 1], [], []>} : vector<8x128xbf16>, vector<128x32xbf16>, vector<8x32xf32> -> vector<8x32xf32>
    %34 = arith.truncf %33 : vector<8x32xf32> to vector<8x32xbf16>
    %c128_33 = arith.constant 128 : index
    %c0_34 = arith.constant 0 : index
    %35 = vector.load %arg5[%c128_33, %c0_34] : memref<544x128xbf16, #tpu.memory_space<vmem>>, vector<32x128xbf16>
    %cst_35 = arith.constant dense<0.000000e+00> : vector<8x128xf32>
    %36 = tpu.matmul %34, %35, %cst_35 {dimension_numbers = #tpu.dot_dimension_numbers<[1], [0], [0], [1], [0, 0, 1, 1], [], []>} : vector<8x32xbf16>, vector<32x128xbf16>, vector<8x128xf32> -> vector<8x128xf32>
    %37 = arith.addf %30, %36 : vector<8x128xf32>
    %c0_36 = arith.constant 0 : index
    %c640 = arith.constant 640 : index
    %38 = vector.load %arg2[%c0_36, %c640] : memref<8x2176xbf16, #tpu.memory_space<vmem>>, vector<8x128xbf16>
    %c0_37 = arith.constant 0 : index
    %c0_38 = arith.constant 0 : index
    %39 = vector.load %arg4[%c0_37, %c0_38] : memref<128x32xbf16, #tpu.memory_space<vmem>>, vector<128x32xbf16>
    %cst_39 = arith.constant dense<0.000000e+00> : vector<8x32xf32>
    %40 = tpu.matmul %38, %39, %cst_39 {dimension_numbers = #tpu.dot_dimension_numbers<[1], [0], [0], [1], [0, 0, 1, 1], [], []>} : vector<8x128xbf16>, vector<128x32xbf16>, vector<8x32xf32> -> vector<8x32xf32>
    %41 = arith.truncf %40 : vector<8x32xf32> to vector<8x32xbf16>
    %c160 = arith.constant 160 : index
    %c0_40 = arith.constant 0 : index
    %42 = vector.load %arg5[%c160, %c0_40] : memref<544x128xbf16, #tpu.memory_space<vmem>>, vector<32x128xbf16>
    %cst_41 = arith.constant dense<0.000000e+00> : vector<8x128xf32>
    %43 = tpu.matmul %41, %42, %cst_41 {dimension_numbers = #tpu.dot_dimension_numbers<[1], [0], [0], [1], [0, 0, 1, 1], [], []>} : vector<8x32xbf16>, vector<32x128xbf16>, vector<8x128xf32> -> vector<8x128xf32>
    %44 = arith.addf %37, %43 : vector<8x128xf32>
    %c0_42 = arith.constant 0 : index
    %c768 = arith.constant 768 : index
    %45 = vector.load %arg2[%c0_42, %c768] : memref<8x2176xbf16, #tpu.memory_space<vmem>>, vector<8x128xbf16>
    %c0_43 = arith.constant 0 : index
    %c0_44 = arith.constant 0 : index
    %46 = vector.load %arg4[%c0_43, %c0_44] : memref<128x32xbf16, #tpu.memory_space<vmem>>, vector<128x32xbf16>
    %cst_45 = arith.constant dense<0.000000e+00> : vector<8x32xf32>
    %47 = tpu.matmul %45, %46, %cst_45 {dimension_numbers = #tpu.dot_dimension_numbers<[1], [0], [0], [1], [0, 0, 1, 1], [], []>} : vector<8x128xbf16>, vector<128x32xbf16>, vector<8x32xf32> -> vector<8x32xf32>
    %48 = arith.truncf %47 : vector<8x32xf32> to vector<8x32xbf16>
    %c192 = arith.constant 192 : index
    %c0_46 = arith.constant 0 : index
    %49 = vector.load %arg5[%c192, %c0_46] : memref<544x128xbf16, #tpu.memory_space<vmem>>, vector<32x128xbf16>
    %cst_47 = arith.constant dense<0.000000e+00> : vector<8x128xf32>
    %50 = tpu.matmul %48, %49, %cst_47 {dimension_numbers = #tpu.dot_dimension_numbers<[1], [0], [0], [1], [0, 0, 1, 1], [], []>} : vector<8x32xbf16>, vector<32x128xbf16>, vector<8x128xf32> -> vector<8x128xf32>
    %51 = arith.addf %44, %50 : vector<8x128xf32>
    %c0_48 = arith.constant 0 : index
    %c896 = arith.constant 896 : index
    %52 = vector.load %arg2[%c0_48, %c896] : memref<8x2176xbf16, #tpu.memory_space<vmem>>, vector<8x128xbf16>
    %c0_49 = arith.constant 0 : index
    %c0_50 = arith.constant 0 : index
    %53 = vector.load %arg4[%c0_49, %c0_50] : memref<128x32xbf16, #tpu.memory_space<vmem>>, vector<128x32xbf16>
    %cst_51 = arith.constant dense<0.000000e+00> : vector<8x32xf32>
    %54 = tpu.matmul %52, %53, %cst_51 {dimension_numbers = #tpu.dot_dimension_numbers<[1], [0], [0], [1], [0, 0, 1, 1], [], []>} : vector<8x128xbf16>, vector<128x32xbf16>, vector<8x32xf32> -> vector<8x32xf32>
    %55 = arith.truncf %54 : vector<8x32xf32> to vector<8x32xbf16>
    %c224 = arith.constant 224 : index
    %c0_52 = arith.constant 0 : index
    %56 = vector.load %arg5[%c224, %c0_52] : memref<544x128xbf16, #tpu.memory_space<vmem>>, vector<32x128xbf16>
    %cst_53 = arith.constant dense<0.000000e+00> : vector<8x128xf32>
    %57 = tpu.matmul %55, %56, %cst_53 {dimension_numbers = #tpu.dot_dimension_numbers<[1], [0], [0], [1], [0, 0, 1, 1], [], []>} : vector<8x32xbf16>, vector<32x128xbf16>, vector<8x128xf32> -> vector<8x128xf32>
    %58 = arith.addf %51, %57 : vector<8x128xf32>
    %c0_54 = arith.constant 0 : index
    %c1024 = arith.constant 1024 : index
    %59 = vector.load %arg2[%c0_54, %c1024] : memref<8x2176xbf16, #tpu.memory_space<vmem>>, vector<8x128xbf16>
    %c0_55 = arith.constant 0 : index
    %c0_56 = arith.constant 0 : index
    %60 = vector.load %arg4[%c0_55, %c0_56] : memref<128x32xbf16, #tpu.memory_space<vmem>>, vector<128x32xbf16>
    %cst_57 = arith.constant dense<0.000000e+00> : vector<8x32xf32>
    %61 = tpu.matmul %59, %60, %cst_57 {dimension_numbers = #tpu.dot_dimension_numbers<[1], [0], [0], [1], [0, 0, 1, 1], [], []>} : vector<8x128xbf16>, vector<128x32xbf16>, vector<8x32xf32> -> vector<8x32xf32>
    %62 = arith.truncf %61 : vector<8x32xf32> to vector<8x32xbf16>
    %c256_58 = arith.constant 256 : index
    %c0_59 = arith.constant 0 : index
    %63 = vector.load %arg5[%c256_58, %c0_59] : memref<544x128xbf16, #tpu.memory_space<vmem>>, vector<32x128xbf16>
    %cst_60 = arith.constant dense<0.000000e+00> : vector<8x128xf32>
    %64 = tpu.matmul %62, %63, %cst_60 {dimension_numbers = #tpu.dot_dimension_numbers<[1], [0], [0], [1], [0, 0, 1, 1], [], []>} : vector<8x32xbf16>, vector<32x128xbf16>, vector<8x128xf32> -> vector<8x128xf32>
    %65 = arith.addf %58, %64 : vector<8x128xf32>
    %c0_61 = arith.constant 0 : index
    %c1152 = arith.constant 1152 : index
    %66 = vector.load %arg2[%c0_61, %c1152] : memref<8x2176xbf16, #tpu.memory_space<vmem>>, vector<8x128xbf16>
    %c0_62 = arith.constant 0 : index
    %c0_63 = arith.constant 0 : index
    %67 = vector.load %arg4[%c0_62, %c0_63] : memref<128x32xbf16, #tpu.memory_space<vmem>>, vector<128x32xbf16>
    %cst_64 = arith.constant dense<0.000000e+00> : vector<8x32xf32>
    %68 = tpu.matmul %66, %67, %cst_64 {dimension_numbers = #tpu.dot_dimension_numbers<[1], [0], [0], [1], [0, 0, 1, 1], [], []>} : vector<8x128xbf16>, vector<128x32xbf16>, vector<8x32xf32> -> vector<8x32xf32>
    %69 = arith.truncf %68 : vector<8x32xf32> to vector<8x32xbf16>
    %c288 = arith.constant 288 : index
    %c0_65 = arith.constant 0 : index
    %70 = vector.load %arg5[%c288, %c0_65] : memref<544x128xbf16, #tpu.memory_space<vmem>>, vector<32x128xbf16>
    %cst_66 = arith.constant dense<0.000000e+00> : vector<8x128xf32>
    %71 = tpu.matmul %69, %70, %cst_66 {dimension_numbers = #tpu.dot_dimension_numbers<[1], [0], [0], [1], [0, 0, 1, 1], [], []>} : vector<8x32xbf16>, vector<32x128xbf16>, vector<8x128xf32> -> vector<8x128xf32>
    %72 = arith.addf %65, %71 : vector<8x128xf32>
    %c0_67 = arith.constant 0 : index
    %c1280 = arith.constant 1280 : index
    %73 = vector.load %arg2[%c0_67, %c1280] : memref<8x2176xbf16, #tpu.memory_space<vmem>>, vector<8x128xbf16>
    %c0_68 = arith.constant 0 : index
    %c0_69 = arith.constant 0 : index
    %74 = vector.load %arg4[%c0_68, %c0_69] : memref<128x32xbf16, #tpu.memory_space<vmem>>, vector<128x32xbf16>
    %cst_70 = arith.constant dense<0.000000e+00> : vector<8x32xf32>
    %75 = tpu.matmul %73, %74, %cst_70 {dimension_numbers = #tpu.dot_dimension_numbers<[1], [0], [0], [1], [0, 0, 1, 1], [], []>} : vector<8x128xbf16>, vector<128x32xbf16>, vector<8x32xf32> -> vector<8x32xf32>
    %76 = arith.truncf %75 : vector<8x32xf32> to vector<8x32xbf16>
    %c320 = arith.constant 320 : index
    %c0_71 = arith.constant 0 : index
    %77 = vector.load %arg5[%c320, %c0_71] : memref<544x128xbf16, #tpu.memory_space<vmem>>, vector<32x128xbf16>
    %cst_72 = arith.constant dense<0.000000e+00> : vector<8x128xf32>
    %78 = tpu.matmul %76, %77, %cst_72 {dimension_numbers = #tpu.dot_dimension_numbers<[1], [0], [0], [1], [0, 0, 1, 1], [], []>} : vector<8x32xbf16>, vector<32x128xbf16>, vector<8x128xf32> -> vector<8x128xf32>
    %79 = arith.addf %72, %78 : vector<8x128xf32>
    %c0_73 = arith.constant 0 : index
    %c1408 = arith.constant 1408 : index
    %80 = vector.load %arg2[%c0_73, %c1408] : memref<8x2176xbf16, #tpu.memory_space<vmem>>, vector<8x128xbf16>
    %c0_74 = arith.constant 0 : index
    %c0_75 = arith.constant 0 : index
    %81 = vector.load %arg4[%c0_74, %c0_75] : memref<128x32xbf16, #tpu.memory_space<vmem>>, vector<128x32xbf16>
    %cst_76 = arith.constant dense<0.000000e+00> : vector<8x32xf32>
    %82 = tpu.matmul %80, %81, %cst_76 {dimension_numbers = #tpu.dot_dimension_numbers<[1], [0], [0], [1], [0, 0, 1, 1], [], []>} : vector<8x128xbf16>, vector<128x32xbf16>, vector<8x32xf32> -> vector<8x32xf32>
    %83 = arith.truncf %82 : vector<8x32xf32> to vector<8x32xbf16>
    %c352 = arith.constant 352 : index
    %c0_77 = arith.constant 0 : index
    %84 = vector.load %arg5[%c352, %c0_77] : memref<544x128xbf16, #tpu.memory_space<vmem>>, vector<32x128xbf16>
    %cst_78 = arith.constant dense<0.000000e+00> : vector<8x128xf32>
    %85 = tpu.matmul %83, %84, %cst_78 {dimension_numbers = #tpu.dot_dimension_numbers<[1], [0], [0], [1], [0, 0, 1, 1], [], []>} : vector<8x32xbf16>, vector<32x128xbf16>, vector<8x128xf32> -> vector<8x128xf32>
    %86 = arith.addf %79, %85 : vector<8x128xf32>
    %c0_79 = arith.constant 0 : index
    %c1536 = arith.constant 1536 : index
    %87 = vector.load %arg2[%c0_79, %c1536] : memref<8x2176xbf16, #tpu.memory_space<vmem>>, vector<8x128xbf16>
    %c0_80 = arith.constant 0 : index
    %c0_81 = arith.constant 0 : index
    %88 = vector.load %arg4[%c0_80, %c0_81] : memref<128x32xbf16, #tpu.memory_space<vmem>>, vector<128x32xbf16>
    %cst_82 = arith.constant dense<0.000000e+00> : vector<8x32xf32>
    %89 = tpu.matmul %87, %88, %cst_82 {dimension_numbers = #tpu.dot_dimension_numbers<[1], [0], [0], [1], [0, 0, 1, 1], [], []>} : vector<8x128xbf16>, vector<128x32xbf16>, vector<8x32xf32> -> vector<8x32xf32>
    %90 = arith.truncf %89 : vector<8x32xf32> to vector<8x32xbf16>
    %c384_83 = arith.constant 384 : index
    %c0_84 = arith.constant 0 : index
    %91 = vector.load %arg5[%c384_83, %c0_84] : memref<544x128xbf16, #tpu.memory_space<vmem>>, vector<32x128xbf16>
    %cst_85 = arith.constant dense<0.000000e+00> : vector<8x128xf32>
    %92 = tpu.matmul %90, %91, %cst_85 {dimension_numbers = #tpu.dot_dimension_numbers<[1], [0], [0], [1], [0, 0, 1, 1], [], []>} : vector<8x32xbf16>, vector<32x128xbf16>, vector<8x128xf32> -> vector<8x128xf32>
    %93 = arith.addf %86, %92 : vector<8x128xf32>
    %c0_86 = arith.constant 0 : index
    %c1664 = arith.constant 1664 : index
    %94 = vector.load %arg2[%c0_86, %c1664] : memref<8x2176xbf16, #tpu.memory_space<vmem>>, vector<8x128xbf16>
    %c0_87 = arith.constant 0 : index
    %c0_88 = arith.constant 0 : index
    %95 = vector.load %arg4[%c0_87, %c0_88] : memref<128x32xbf16, #tpu.memory_space<vmem>>, vector<128x32xbf16>
    %cst_89 = arith.constant dense<0.000000e+00> : vector<8x32xf32>
    %96 = tpu.matmul %94, %95, %cst_89 {dimension_numbers = #tpu.dot_dimension_numbers<[1], [0], [0], [1], [0, 0, 1, 1], [], []>} : vector<8x128xbf16>, vector<128x32xbf16>, vector<8x32xf32> -> vector<8x32xf32>
    %97 = arith.truncf %96 : vector<8x32xf32> to vector<8x32xbf16>
    %c416 = arith.constant 416 : index
    %c0_90 = arith.constant 0 : index
    %98 = vector.load %arg5[%c416, %c0_90] : memref<544x128xbf16, #tpu.memory_space<vmem>>, vector<32x128xbf16>
    %cst_91 = arith.constant dense<0.000000e+00> : vector<8x128xf32>
    %99 = tpu.matmul %97, %98, %cst_91 {dimension_numbers = #tpu.dot_dimension_numbers<[1], [0], [0], [1], [0, 0, 1, 1], [], []>} : vector<8x32xbf16>, vector<32x128xbf16>, vector<8x128xf32> -> vector<8x128xf32>
    %100 = arith.addf %93, %99 : vector<8x128xf32>
    %c0_92 = arith.constant 0 : index
    %c1792 = arith.constant 1792 : index
    %101 = vector.load %arg2[%c0_92, %c1792] : memref<8x2176xbf16, #tpu.memory_space<vmem>>, vector<8x128xbf16>
    %c0_93 = arith.constant 0 : index
    %c0_94 = arith.constant 0 : index
    %102 = vector.load %arg4[%c0_93, %c0_94] : memref<128x32xbf16, #tpu.memory_space<vmem>>, vector<128x32xbf16>
    %cst_95 = arith.constant dense<0.000000e+00> : vector<8x32xf32>
    %103 = tpu.matmul %101, %102, %cst_95 {dimension_numbers = #tpu.dot_dimension_numbers<[1], [0], [0], [1], [0, 0, 1, 1], [], []>} : vector<8x128xbf16>, vector<128x32xbf16>, vector<8x32xf32> -> vector<8x32xf32>
    %104 = arith.truncf %103 : vector<8x32xf32> to vector<8x32xbf16>
    %c448 = arith.constant 448 : index
    %c0_96 = arith.constant 0 : index
    %105 = vector.load %arg5[%c448, %c0_96] : memref<544x128xbf16, #tpu.memory_space<vmem>>, vector<32x128xbf16>
    %cst_97 = arith.constant dense<0.000000e+00> : vector<8x128xf32>
    %106 = tpu.matmul %104, %105, %cst_97 {dimension_numbers = #tpu.dot_dimension_numbers<[1], [0], [0], [1], [0, 0, 1, 1], [], []>} : vector<8x32xbf16>, vector<32x128xbf16>, vector<8x128xf32> -> vector<8x128xf32>
    %107 = arith.addf %100, %106 : vector<8x128xf32>
    %c0_98 = arith.constant 0 : index
    %c1920 = arith.constant 1920 : index
    %108 = vector.load %arg2[%c0_98, %c1920] : memref<8x2176xbf16, #tpu.memory_space<vmem>>, vector<8x128xbf16>
    %c0_99 = arith.constant 0 : index
    %c0_100 = arith.constant 0 : index
    %109 = vector.load %arg4[%c0_99, %c0_100] : memref<128x32xbf16, #tpu.memory_space<vmem>>, vector<128x32xbf16>
    %cst_101 = arith.constant dense<0.000000e+00> : vector<8x32xf32>
    %110 = tpu.matmul %108, %109, %cst_101 {dimension_numbers = #tpu.dot_dimension_numbers<[1], [0], [0], [1], [0, 0, 1, 1], [], []>} : vector<8x128xbf16>, vector<128x32xbf16>, vector<8x32xf32> -> vector<8x32xf32>
    %111 = arith.truncf %110 : vector<8x32xf32> to vector<8x32xbf16>
    %c480 = arith.constant 480 : index
    %c0_102 = arith.constant 0 : index
    %112 = vector.load %arg5[%c480, %c0_102] : memref<544x128xbf16, #tpu.memory_space<vmem>>, vector<32x128xbf16>
    %cst_103 = arith.constant dense<0.000000e+00> : vector<8x128xf32>
    %113 = tpu.matmul %111, %112, %cst_103 {dimension_numbers = #tpu.dot_dimension_numbers<[1], [0], [0], [1], [0, 0, 1, 1], [], []>} : vector<8x32xbf16>, vector<32x128xbf16>, vector<8x128xf32> -> vector<8x128xf32>
    %114 = arith.addf %107, %113 : vector<8x128xf32>
    %c0_104 = arith.constant 0 : index
    %c2048 = arith.constant 2048 : index
    %115 = vector.load %arg2[%c0_104, %c2048] : memref<8x2176xbf16, #tpu.memory_space<vmem>>, vector<8x128xbf16>
    %c0_105 = arith.constant 0 : index
    %c0_106 = arith.constant 0 : index
    %116 = vector.load %arg4[%c0_105, %c0_106] : memref<128x32xbf16, #tpu.memory_space<vmem>>, vector<128x32xbf16>
    %cst_107 = arith.constant dense<0.000000e+00> : vector<8x32xf32>
    %117 = tpu.matmul %115, %116, %cst_107 {dimension_numbers = #tpu.dot_dimension_numbers<[1], [0], [0], [1], [0, 0, 1, 1], [], []>} : vector<8x128xbf16>, vector<128x32xbf16>, vector<8x32xf32> -> vector<8x32xf32>
    %118 = arith.truncf %117 : vector<8x32xf32> to vector<8x32xbf16>
    %c512_108 = arith.constant 512 : index
    %c0_109 = arith.constant 0 : index
    %119 = vector.load %arg5[%c512_108, %c0_109] : memref<544x128xbf16, #tpu.memory_space<vmem>>, vector<32x128xbf16>
    %cst_110 = arith.constant dense<0.000000e+00> : vector<8x128xf32>
    %120 = tpu.matmul %118, %119, %cst_110 {dimension_numbers = #tpu.dot_dimension_numbers<[1], [0], [0], [1], [0, 0, 1, 1], [], []>} : vector<8x32xbf16>, vector<32x128xbf16>, vector<8x128xf32> -> vector<8x128xf32>
    %121 = arith.addf %114, %120 : vector<8x128xf32>
    %c0_111 = arith.constant 0 : index
    %c0_112 = arith.constant 0 : index
    %122 = vector.load %arg6[%c0_111, %c0_112] : memref<1x128xf32, #tpu.memory_space<vmem>>, vector<1x128xf32>
    %123 = vector.broadcast %122 : vector<1x128xf32> to vector<8x128xf32>
    %124 = arith.addf %121, %123 : vector<8x128xf32>
    %cst_113 = arith.constant dense<0.000000e+00> : vector<8xf32>
    %125 = vector.multi_reduction <add>, %124, %cst_113 [1] : vector<8x128xf32> to vector<8xf32>
    %126 = vector.shape_cast %125 : vector<8xf32> to vector<8x1xf32>
    %cst_114 = arith.constant 1.280000e+02 : f32
    %127 = vector.broadcast %cst_114 : f32 to vector<8x1xf32>
    %128 = arith.divf %126, %127 : vector<8x1xf32>
    %129 = vector.broadcast %128 : vector<8x1xf32> to vector<8x128xf32>
    %130 = arith.subf %124, %129 : vector<8x128xf32>
    %131 = arith.mulf %130, %130 : vector<8x128xf32>
    %cst_115 = arith.constant dense<0.000000e+00> : vector<8xf32>
    %132 = vector.multi_reduction <add>, %131, %cst_115 [1] : vector<8x128xf32> to vector<8xf32>
    %133 = vector.shape_cast %132 : vector<8xf32> to vector<8x1xf32>
    %cst_116 = arith.constant 1.280000e+02 : f32
    %134 = vector.broadcast %cst_116 : f32 to vector<8x1xf32>
    %135 = arith.divf %133, %134 : vector<8x1xf32>
    %136 = vector.broadcast %128 : vector<8x1xf32> to vector<8x128xf32>
    %137 = arith.subf %124, %136 : vector<8x128xf32>
    %cst_117 = arith.constant 9.99999974E-6 : f32
    %138 = vector.broadcast %cst_117 : f32 to vector<8x1xf32>
    %139 = arith.addf %135, %138 : vector<8x1xf32>
    %140 = math.rsqrt %139 : vector<8x1xf32>
    %141 = vector.broadcast %140 : vector<8x1xf32> to vector<8x128xf32>
    %142 = arith.mulf %137, %141 : vector<8x128xf32>
    %c0_118 = arith.constant 0 : index
    %c0_119 = arith.constant 0 : index
    %143 = vector.load %arg7[%c0_118, %c0_119] : memref<1x128xf32, #tpu.memory_space<vmem>>, vector<1x128xf32>
    %144 = vector.broadcast %143 : vector<1x128xf32> to vector<8x128xf32>
    %145 = arith.mulf %142, %144 : vector<8x128xf32>
    %c0_120 = arith.constant 0 : index
    %c0_121 = arith.constant 0 : index
    %146 = vector.load %arg8[%c0_120, %c0_121] : memref<1x128xf32, #tpu.memory_space<vmem>>, vector<1x128xf32>
    %147 = vector.broadcast %146 : vector<1x128xf32> to vector<8x128xf32>
    %148 = arith.addf %145, %147 : vector<8x128xf32>
    %149 = arith.truncf %148 : vector<8x128xf32> to vector<8x128xbf16>
    %c0_122 = arith.constant 0 : index
    %c0_123 = arith.constant 0 : index
    %150 = vector.load %arg9[%c0_122, %c0_123] : memref<128x128xbf16, #tpu.memory_space<vmem>>, vector<128x128xbf16>
    %cst_124 = arith.constant dense<0.000000e+00> : vector<8x128xf32>
    %151 = tpu.matmul %149, %150, %cst_124 {dimension_numbers = #tpu.dot_dimension_numbers<[1], [0], [0], [1], [0, 0, 1, 1], [], []>} : vector<8x128xbf16>, vector<128x128xbf16>, vector<8x128xf32> -> vector<8x128xf32>
    %c0_125 = arith.constant 0 : index
    %c0_126 = arith.constant 0 : index
    %152 = vector.load %arg10[%c0_125, %c0_126] : memref<1x128xf32, #tpu.memory_space<vmem>>, vector<1x128xf32>
    %153 = vector.broadcast %152 : vector<1x128xf32> to vector<8x128xf32>
    %154 = arith.addf %151, %153 : vector<8x128xf32>
    %cst_127 = arith.constant 0.000000e+00 : f32
    %155 = vector.broadcast %cst_127 : f32 to vector<8x128xf32>
    %156 = arith.maximumf %154, %155 : vector<8x128xf32>
    %157 = arith.truncf %156 : vector<8x128xf32> to vector<8x128xbf16>
    %c0_128 = arith.constant 0 : index
    %c0_129 = arith.constant 0 : index
    %158 = vector.load %arg11[%c0_128, %c0_129] : memref<128x128xbf16, #tpu.memory_space<vmem>>, vector<128x128xbf16>
    %cst_130 = arith.constant dense<0.000000e+00> : vector<8x128xf32>
    %159 = tpu.matmul %157, %158, %cst_130 {dimension_numbers = #tpu.dot_dimension_numbers<[1], [0], [0], [1], [0, 0, 1, 1], [], []>} : vector<8x128xbf16>, vector<128x128xbf16>, vector<8x128xf32> -> vector<8x128xf32>
    %c0_131 = arith.constant 0 : index
    %c0_132 = arith.constant 0 : index
    %160 = vector.load %arg12[%c0_131, %c0_132] : memref<1x128xf32, #tpu.memory_space<vmem>>, vector<1x128xf32>
    %161 = vector.broadcast %160 : vector<1x128xf32> to vector<8x128xf32>
    %162 = arith.addf %159, %161 : vector<8x128xf32>
    %c0_133 = arith.constant 0 : index
    %c0_134 = arith.constant 0 : index
    %163 = vector.load %arg13[%c0_133, %c0_134] : memref<8x128xf32, #tpu.memory_space<vmem>>, vector<8x128xf32>
    tpu.vector_store %arg13[%c0_133, %c0_134], %162 {strides = array<i32>} : memref<8x128xf32, #tpu.memory_space<vmem>>, vector<8x128xf32>,
    return
  }
  func.func @transform_0(%arg0: i32) -> (i32, i32) {
    %c0_i32 = arith.constant 0 : i32
    %c0_i32_0 = arith.constant 0 : i32
    return %arg0, %c0_i32 : i32, i32
  }
  func.func @transform_1(%arg0: i32) -> (i32, i32) {
    %c0_i32 = arith.constant 0 : i32
    %c0_i32_0 = arith.constant 0 : i32
    return %arg0, %c0_i32 : i32, i32
  }
  func.func @transform_2(%arg0: i32) -> (i32, i32) {
    %c0_i32 = arith.constant 0 : i32
    %c0_i32_0 = arith.constant 0 : i32
    %c0_i32_1 = arith.constant 0 : i32
    return %c0_i32, %c0_i32_0 : i32, i32
  }
  func.func @transform_3(%arg0: i32) -> (i32, i32) {
    %c0_i32 = arith.constant 0 : i32
    %c0_i32_0 = arith.constant 0 : i32
    %c0_i32_1 = arith.constant 0 : i32
    return %c0_i32, %c0_i32_0 : i32, i32
  }
  func.func @transform_4(%arg0: i32) -> (i32, i32) {
    %c0_i32 = arith.constant 0 : i32
    %c0_i32_0 = arith.constant 0 : i32
    %c0_i32_1 = arith.constant 0 : i32
    return %c0_i32, %c0_i32_0 : i32, i32
  }
  func.func @transform_5(%arg0: i32) -> (i32, i32) {
    %c0_i32 = arith.constant 0 : i32
    %c0_i32_0 = arith.constant 0 : i32
    %c0_i32_1 = arith.constant 0 : i32
    return %c0_i32, %c0_i32_0 : i32, i32
  }
  func.func @transform_6(%arg0: i32) -> (i32, i32) {
    %c0_i32 = arith.constant 0 : i32
    %c0_i32_0 = arith.constant 0 : i32
    %c0_i32_1 = arith.constant 0 : i32
    return %c0_i32, %c0_i32_0 : i32, i32
  }
  func.func @transform_7(%arg0: i32) -> (i32, i32) {
    %c0_i32 = arith.constant 0 : i32
    %c0_i32_0 = arith.constant 0 : i32
    %c0_i32_1 = arith.constant 0 : i32
    return %c0_i32, %c0_i32_0 : i32, i32
  }
  func.func @transform_8(%arg0: i32) -> (i32, i32) {
    %c0_i32 = arith.constant 0 : i32
    %c0_i32_0 = arith.constant 0 : i32
    %c0_i32_1 = arith.constant 0 : i32
    return %c0_i32, %c0_i32_0 : i32, i32
  }
  func.func @transform_9(%arg0: i32) -> (i32, i32) {
    %c0_i32 = arith.constant 0 : i32
    %c0_i32_0 = arith.constant 0 : i32
    %c0_i32_1 = arith.constant 0 : i32
    return %c0_i32, %c0_i32_0 : i32, i32
  }
  func.func @transform_10(%arg0: i32) -> (i32, i32) {
    %c0_i32 = arith.constant 0 : i32
    %c0_i32_0 = arith.constant 0 : i32
    %c0_i32_1 = arith.constant 0 : i32
    return %c0_i32, %c0_i32_0 : i32, i32
  }
  func.func @transform_11(%arg0: i32) -> (i32, i32) {
    %c0_i32 = arith.constant 0 : i32
    %c0_i32_0 = arith.constant 0 : i32
    %c0_i32_1 = arith.constant 0 : i32
    return %c0_i32, %c0_i32_0 : i32, i32
  }
  func.func @transform_12(%arg0: i32) -> (i32, i32) {
    %c0_i32 = arith.constant 0 : i32
    %c0_i32_0 = arith.constant 0 : i32
    return %arg0, %c0_i32 : i32, i32
  }
}

</mosaic_0001>

<bundles_post_ra>
// kernel: tpu_custom_call.1
= control target key start
LH: loop header
LB: loop body
LE: loop exit
PB: predicated region body
PF: predicated region fallthrough
CT: control target
= control target key end

     0   :  { %s6769_s0 = inlined_call_operand.hbm [shape: bf16[16,2048], index: 0, kind: input, shape index: {}]   ;;  %s6770_s1 = inlined_call_operand.hbm [shape: bf16[16,2176], index: 1, kind: input, shape index: {}]   ;;  %s6771_s2 = inlined_call_operand.hbm [shape: bf16[2048,128], index: 2, kind: input, shape index: {}]   ;;  %s6772_s3 = inlined_call_operand.vmem [shape: bf16[128,32], index: 3, kind: input, shape index: {}]   ;;  %s6773_s4 = inlined_call_operand.hbm [shape: bf16[544,128], index: 4, kind: input, shape index: {}]   ;;  %s6774_s5 = inlined_call_operand.vmem [shape: f32[1,128], index: 5, kind: input, shape index: {}]   ;;  %s6775_s6 = inlined_call_operand.vmem [shape: f32[1,128], index: 6, kind: input, shape index: {}]   ;;  %s6776_s7 = inlined_call_operand.vmem [shape: f32[1,128], index: 7, kind: input, shape index: {}]   ;;  %s6777_s8 = inlined_call_operand.vmem [shape: bf16[128,128], index: 8, kind: input, shape index: {}]   ;;  %s6778_s9 = inlined_call_operand.vmem [shape: f32[1,128], index: 9, kind: input, shape index: {}]   ;;  %s6779_s10 = inlined_call_operand.hbm [shape: bf16[128,128], index: 10, kind: input, shape index: {}]   ;;  %s6780_s11 = inlined_call_operand.vmem [shape: f32[1,128], index: 11, kind: input, shape index: {}]   ;;  %s6781_s12 = inlined_call_operand.hbm [shape: f32[16,128], index: 12, kind: output, shape index: {}]  }
   0x1   :  { %6789 = sst [smem:[#allocation19_spill]] %s6769_s0 }
   0x2   :  { %6790 = sst [smem:[#allocation20_spill]] %s6771_s2 }
   0x3   :  { %6791 = sst [smem:[#allocation21_spill]] %s6776_s7 }
   0x4   :  { %6792 = sst [smem:[#allocation22_spill]] %s6778_s9 }
   0x5   :  { %6793 = sst [smem:[#allocation23_spill]] %s6780_s11 }
   0x6   :  { %6794 = sst [smem:[#allocation24_spill]] %s6781_s12 }
   0x7   :  { %17 = vsyncpa [#allocation3], 0 }
   0x8   :  { %19 = vsyncpa [#allocation3 + $0x1], 0 }
   0x9   :  { %20 = vsyncpa [#allocation6], 0 }
   0xa   :  { %22 = vsyncpa [#allocation6 + $0x1], 0 }
   0xb   :  { %23 = vsyncpa [#allocation9], 0 }
   0xc   :  { %24 = vsyncpa [#allocation4], 0 }
   0xd   :  { %26 = vsyncpa [#allocation4 + $0x1], 0  ;;  %s5882_s21 = smov 0   ;;  %s5884_s22 = smov 0  }
   0xe   :  { %s5886_s23 = smov 0   ;;  %s5888_s24 = smov 0  }
   0xf LB: > { %6795 = sst [smem:[#allocation17_spill]] %s5793_s21  ;;  %s5903_s25 = sadd.s32 4294967295, %s5805_s24   ;;  %s5805_s24 = sphi %s5888_s24, %s6827_s24   ;;  %s5801_s23 = sphi %s5886_s23, %s6826_s23   ;;  %s5797_s22 = sphi %s5884_s22, %s6825_s22   ;;  %s5793_s21 = sphi %s5882_s21, %s6824_s21  }
  0x10   : > { %s4115_s26 = sadd.s32 4294967294, %s5805_s24   ;;  %p52_p0 = scmp.ne.s32.totalorder %s5797_s22, %s5793_s21 }
  0x11   : > { %p6784_p1 = scmp.eq.s32.totalorder %s5903_s25, 0  ;;  %p318_p3 = scmp.eq.s32.totalorder %s4115_s26, 1 }
  0x12   : > { %p4116_p5 = scmp.ge.s32.totalorder %s5805_s24, 1  ;;  %p325_p7 = scmp.lt.s32.totalorder %s5805_s24, 3 }
  0x13   : > { %p5912_p4 = por %p6784_p1, %p52_p0  ;;  %p5917_p6 = por %p318_p3, %p52_p0 }
  0x14   : > { %p5922_p8 = pnand %p4116_p5, %p325_p7  ;;  %s5807_s30 = smov [#allocation7]  }
  0x15   : > { %s6796_s27 = scalar_select %p5912_p4, 1, 0 }
  0x16   : > { %s6797_s28 = scalar_select %p5917_p6, 1, 0 }
  0x17   : > { %s6799_s29 = scalar_select %p5922_p8, 1, 0 }
  0x18   : > { %6798 = sst [smem:[#allocation18_spill]] %s6797_s28  ;;  %s337_s13 = sshll.u32 %s5807_s30, 4  ;;  %s5926_s13 = int_to_ptr.vmem [resolvable:$true] %s337_s13 }
  0x19   : > { %p5295_p9 = pneg %p5922_p8  ;;  %s5808_s15 = smov [#allocation8]  }
  0x1a   : > { %s353_s16 = sshll.u32 %s5808_s15, 4  ;;  %s5809_s17 = smov [#allocation10]   ;;  %s5937_s16 = int_to_ptr.vmem [resolvable:$true] %s353_s16 }
  0x1b   : > { %p5933_p11 = pnand %p5295_p9, %p6784_p1  ;;  %s5939_s18 = sshll.u32 %s5809_s17, 4  ;;  %s382_s18 = int_to_ptr.vmem [resolvable:$true] %s5939_s18 }
  0x1c   : > { %s6801_s2 = sld [smem:[#allocation20_spill]] }
  0x1d   : > { %p5949_p13 = pneg %p5933_p11 }
  0x22   : > { %s5583_s26 = scalar_lea.hbm %s6801_s2, 16384 }
  0x23   : > { %p5584_p12 = scmp.ne.s32.totalorder %s6801_s2, %s5583_s26  ;;  %p5590_p5 = scmp.lt.u32.totalorder %s5583_s26, %s6801_s2 }
  0x25   : > { %p5586_p0 = pnand %p5949_p13, %p5584_p12 }
  0x27   : > { %p5587_p3 = pneg %p5586_p0 }
  0x29   : > { %p5592_p7 = pnand %p5590_p5, %p5587_p3 }
  0x2b   : > { %5595 = shalt.err (!%p5592_p7)
}
  0x2c   : > { %s5596_s28 = scalar_lea.vmem %s5926_s13, 16384  ;;  %p5604_p2 = scmp.lt.s32.totalorder %s5926_s13, %s5926_s13 }
  0x2d   : > { %p5597_p9 = scmp.ne.s32.totalorder %s5926_s13, %s5596_s28  ;;  %p5605_p6 = scmp.lt.s32.totalorder %s5596_s28, %s5596_s28 }
  0x2f   : > { %p5599_p10 = pnand %p5597_p9, %p5949_p13  ;;  %p5606_p12 = por %p5605_p6, %p5604_p2 }
  0x31   : > { %p5600_p1 = pneg %p5599_p10 }
  0x33   : > { %p5607_p0 = pnand %p5606_p12, %p5600_p1 }
  0x35   : > { %5610 = shalt.err (!%p5607_p0)
}
  0x36   : > { %s5810_s19 = smov 64   ;;  %s5811_s20 = smov 4  }
  0x37   : > { %5298 = dma.hbm_to_vmem [thread:$0]  (!%p5933_p11), %s6801_s2, 16384, %s5926_s13, [#allocation6], %s5810_s19, %s5810_s19, %s5811_s20  }
  0x38   : > { %s5611_s28 = scalar_lea.hbm %s6773_s4, 4352 }
  0x39   : > { %p5612_p1 = scmp.ne.s32.totalorder %s6773_s4, %s5611_s28  ;;  %p5618_p10 = scmp.lt.u32.totalorder %s5611_s28, %s6773_s4 }
  0x3b   : > { %p5614_p2 = pnand %p5612_p1, %p5949_p13 }
  0x3d   : > { %p5615_p6 = pneg %p5614_p2 }
  0x3f   : > { %p5620_p3 = pnand %p5618_p10, %p5615_p6 }
  0x41   : > { %5623 = shalt.err (!%p5620_p3)
}
  0x42   : > { %s5624_s13 = scalar_lea.vmem %s5937_s16, 4352  ;;  %p5632_p12 = scmp.lt.s32.totalorder %s5937_s16, %s5937_s16 }
  0x43   : > { %p5625_p5 = scmp.ne.s32.totalorder %s5937_s16, %s5624_s13  ;;  %p5633_p0 = scmp.lt.s32.totalorder %s5624_s13, %s5624_s13 }
  0x45   : > { %p5627_p7 = pnand %p5625_p5, %p5949_p13  ;;  %p5634_p1 = por %p5633_p0, %p5632_p12 }
  0x47   : > { %p5628_p9 = pneg %p5627_p7 }
  0x49   : > { %p5635_p2 = pnand %p5634_p1, %p5628_p9 }
  0x4b   : > { %5638 = shalt.err (!%p5635_p2)
}
  0x4c   : > { %5301 = dma.hbm_to_vmem [thread:$0]  (!%p5933_p11), %s6773_s4, 4352, %s5937_s16, [#allocation9], %s5810_s19, %s5810_s19, %s5811_s20  }
  0x4d   : > { %s5639_s26 = scalar_lea.hbm %s6779_s10, 1024 }
  0x4e   : > { %p5640_p6 = scmp.ne.s32.totalorder %s6779_s10, %s5639_s26  ;;  %p5646_p5 = scmp.lt.u32.totalorder %s5639_s26, %s6779_s10 }
  0x50   : > { %p5642_p10 = pnand %p5640_p6, %p5949_p13 }
  0x52   : > { %p5643_p3 = pneg %p5642_p10 }
  0x54   : > { %p5648_p7 = pnand %p5646_p5, %p5643_p3 }
  0x56   : > { %5651 = shalt.err (!%p5648_p7)
}
  0x57   : > { %s5652_s13 = scalar_lea.vmem %s382_s18, 1024  ;;  %p5660_p1 = scmp.lt.s32.totalorder %s382_s18, %s382_s18 }
  0x58   : > { %p5653_p9 = scmp.ne.s32.totalorder %s382_s18, %s5652_s13  ;;  %p5661_p2 = scmp.lt.s32.totalorder %s5652_s13, %s5652_s13 }
  0x5a   : > { %p5655_p12 = pnand %p5653_p9, %p5949_p13  ;;  %p5662_p4 = por %p5661_p2, %p5660_p1 }
  0x5c   : > { %p5656_p0 = pneg %p5655_p12 }
  0x5e   : > { %p5663_p8 = pnand %p5662_p4, %p5656_p0 }
  0x60   : > { %5666 = shalt.err (!%p5663_p8)
}
  0x61   : > { %5304 = dma.hbm_to_vmem [thread:$0]  (!%p5933_p11), %s6779_s10, 1024, %s382_s18, [#allocation9], %s5810_s19, %s5810_s19, %s5811_s20  }
  0x62   : > { %s6022_s21 = sadd.s32 1, %s5805_s24   ;;  %s39_s9 = sadd.s32 1, %s5801_s23 }
  0x63   : > { %s36_s14 = ssub.s32 %s5805_s24, %s6022_s21  ;;  %p46_p8 = scmp.ne.s32.totalorder %s5801_s23, %s5797_s22 }
  0x64   : > { %p37_p4 = scmp.eq.s32.totalorder %s36_s14, 0  ;;  %p47_p13 = scmp.eq.s32.totalorder %s5805_s24, 0 }
  0x65   : > { %p5319_p6 = scmp.lt.s32.totalorder %s5805_s24, 2  ;;  %p6803_p3 = scmp.eq.s32.totalorder %s5903_s25, 1 }
  0x66   : > { %s6032_s11 = scalar_select %p37_p4, %s5801_s23, %s39_s9  }
  0x67   : > { %p48_p10 = por %p47_p13, %p46_p8  ;;  %p6036_p5 = por %p6803_p3, %p46_p8 }
  0x68   : > { %s6041_s26 = sand.u32 1, %s5801_s23   ;;  %s4359_s18 = sshll.u32 %s5805_s24, 10 }
  0x69   : > { %s6804_s12 = scalar_select %p6036_p5, 1, 0 }
  0x6a   : > { %s4121_s19 = sshll.u32 %s6041_s26, 6  ;;  %s6805_s0 = sld [smem:[#allocation19_spill]] }
  0x6b   : > { %s402_s17 = scalar_lea.vmem [#allocation2], %s4121_s19  ;;  %p6050_p11 = pnand %p5319_p6, %p48_p10 }
  0x6c   : > { %s410_s28 = sshll.u32 %s402_s17, 4  ;;  %s399_s7 = scalar_lea.sflag [#allocation3], %s6041_s26  ;;  %s6054_s28 = int_to_ptr.vmem [resolvable:$true] %s410_s28 }
  0x6d   : > { %p5669_p9 = pneg %p6050_p11 }
  0x70   : > { %s6048_s15 = scalar_lea.hbm %s6805_s0, %s4359_s18  ;;  %s5672_s19 = scalar_lea.hbm %s6805_s0, 2048 }
  0x71   : > { %s5667_s14 = scalar_lea.hbm %s6048_s15, 1024  ;;  %p5673_p1 = scmp.lt.u32.totalorder %s6048_s15, %s6805_s0 }
  0x72   : > { %p5668_p7 = scmp.ne.s32.totalorder %s6048_s15, %s5667_s14  ;;  %p5674_p2 = scmp.lt.u32.totalorder %s5672_s19, %s5667_s14 }
  0x73   : > { %p5676_p8 = scmp.lt.u32.totalorder %s5667_s14, %s6048_s15 }
  0x74   : > { %p5670_p12 = pnand %p5669_p9, %p5668_p7  ;;  %p5675_p4 = por %p5674_p2, %p5673_p1 }
  0x76   : > { %p5671_p0 = pneg %p5670_p12  ;;  %p5677_p13 = por %p5676_p8, %p5675_p4 }
  0x78   : > { %p5678_p6 = pnand %p5677_p13, %p5671_p0 }
  0x7a   : > { %5681 = shalt.err (!%p5678_p6)
}
  0x7b   : > { %s5682_s17 = scalar_lea.vmem %s6054_s28, 1024  ;;  %s5812_s9 = smov [#allocation2]  }
  0x7c   : > { %p5683_p10 = scmp.ne.s32.totalorder %s6054_s28, %s5682_s17  ;;  %s5687_s18 = sshll.u32 %s5812_s9, 4  ;;  %s5688_s18 = int_to_ptr.vmem [resolvable:$false] %s5687_s18 }
  0x7d   : > { %s5689_s20 = scalar_lea.vmem %s5688_s18, 2048  ;;  %p5690_p12 = scmp.lt.s32.totalorder %s6054_s28, %s5688_s18 }
  0x7e   : > { %p5685_p3 = pnand %p5683_p10, %p5669_p9  ;;  %p5691_p1 = scmp.lt.s32.totalorder %s5689_s20, %s5682_s17 }
  0x80   : > { %p5686_p7 = pneg %p5685_p3  ;;  %p5692_p2 = por %p5691_p1, %p5690_p12 }
  0x82   : > { %p5693_p4 = pnand %p5692_p2, %p5686_p7 }
  0x84   : > { %5696 = shalt.err (!%p5693_p4)
}
  0x85   : > { %5308 = dma.hbm_to_vmem [thread:$0]  (!%p6050_p11), %s6048_s15, 1024, %s6054_s28, %s399_s7  }
  0x86   : > { %s5274_s14 = smul.u32 68, %s6041_s26  ;;  %s6807_s20 = sand.u32 1, %s5805_s24  }
  0x87   : > { %s5275_s19 = smul.u32 1088, %s5805_s24  ;;  %s418_s0 = scalar_lea.sflag [#allocation6], %s6807_s20 }
  0x88   : > { %s421_s17 = scalar_lea.vmem [#allocation5], %s5274_s14  ;;  %s5702_s28 = scalar_lea.hbm %s6770_s1, 2176 }
  0x89   : > { %s6088_s16 = scalar_lea.hbm %s6770_s1, %s5275_s19  ;;  %s429_s18 = sshll.u32 %s421_s17, 4  ;;  %s430_s18 = int_to_ptr.vmem [resolvable:$true] %s429_s18 }
  0x8a   : > { %s5697_s2 = scalar_lea.hbm %s6088_s16, 1088  ;;  %p5703_p6 = scmp.lt.u32.totalorder %s6088_s16, %s6770_s1 }
  0x8b   : > { %p5698_p0 = scmp.ne.s32.totalorder %s6088_s16, %s5697_s2  ;;  %p5704_p10 = scmp.lt.u32.totalorder %s5702_s28, %s5697_s2 }
  0x8c   : > { %p5706_p7 = scmp.lt.u32.totalorder %s5697_s2, %s6088_s16 }
  0x8d   : > { %p5700_p8 = pnand %p5698_p0, %p5669_p9  ;;  %p5705_p3 = por %p5704_p10, %p5703_p6 }
  0x8f   : > { %p5701_p13 = pneg %p5700_p8  ;;  %p5707_p12 = por %p5706_p7, %p5705_p3 }
  0x91   : > { %p5708_p1 = pnand %p5707_p12, %p5701_p13 }
  0x93   : > { %5711 = shalt.err (!%p5708_p1)
}
  0x94   : > { %s5712_s14 = scalar_lea.vmem %s430_s18, 1088  ;;  %s5813_s30 = smov [#allocation5]  }
  0x95   : > { %p5713_p2 = scmp.ne.s32.totalorder %s430_s18, %s5712_s14  ;;  %s5717_s9 = sshll.u32 %s5813_s30, 4  ;;  %s5718_s9 = int_to_ptr.vmem [resolvable:$false] %s5717_s9 }
  0x96   : > { %s5719_s17 = scalar_lea.vmem %s5718_s9, 2176  ;;  %p5720_p8 = scmp.lt.s32.totalorder %s430_s18, %s5718_s9 }
  0x97   : > { %p5715_p4 = pnand %p5713_p2, %p5669_p9  ;;  %p5721_p5 = scmp.lt.s32.totalorder %s5719_s17, %s5712_s14 }
  0x99   : > { %p5716_p0 = pneg %p5715_p4  ;;  %p5722_p6 = por %p5721_p5, %p5720_p8 }
  0x9b   : > { %p5723_p10 = pnand %p5722_p6, %p5716_p0 }
  0x9d   : > { %5726 = shalt.err (!%p5723_p10)
}
  0x9e   : > { %5311 = dma.hbm_to_vmem [thread:$0]  (!%p6050_p11), %s6088_s16, 1088, %s430_s18, %s418_s0  }
  0x9f   : > { %p6808_p13 = scmp.ne.s32.totalorder %s6799_s29, 0 }
  0xa0   : > { %s6114_s2 = sand.u32 (!%p6808_p13), 1, %s5797_s22   ;;  %p6809_p5 = scmp.ne.s32.totalorder (!%p6808_p13), %s6796_s27, 0 }
  0xa1   : > { %438 = sbr.rel (%p6808_p13) target bundleno = 5229 (0x146d), region = 68  ;;  %s4126_s20 = sshll.u32 (!%p6808_p13), %s6114_s2, 6 }
  0xa2   : > { %s441_s26 = scalar_lea.sflag (!%p6808_p13), [#allocation3], %s6114_s2  ;;  %s6118_s15 = scalar_lea.vmem (!%p6808_p13), [#allocation2], %s4126_s20 }
  0xa8   : > { %5772 = dma.done.wait (%p6809_p5), %s441_s26, 1024  }
  0xa9   : > { %5774 = vsyncadd (%p6809_p5), %s441_s26, 4294966272  ;;  %s449_s0 = sand.u32 1, %s5903_s25   ;;  %s5276_s29 = smul.u32 68, %s6114_s2 }
  0xaa   : > { %s450_s13 = scalar_lea.sflag [#allocation6], %s449_s0 }
  0xab   : > { %s6126_s16 = scalar_lea.vmem [#allocation5], %s5276_s29 }
  0xac   : > { %5776 = dma.done.wait (%p6809_p5), %s450_s13, 1088  }
  0xad   : > { %5778 = vsyncadd (%p6809_p5), %s450_s13, 4294966208  ;;  %p6810_p11 = scmp.eq.s32.totalorder %s5903_s25, 0 }
  0xaf   : > { %5780 = dma.done.wait (%p6810_p11), [#allocation6], 16384   ;;  %p6811_p9 = pmov %p6810_p11 }
  0xb1   : > { %5782 = vsyncadd (%p6811_p9), [#allocation6], 4294950912  ;;  %p6812_p3 = pmov %p6811_p9 }
  0xb3   : > { %5784 = dma.done.wait (%p6812_p3), [#allocation9], 5376   ;;  %p6813_p7 = pmov %p6812_p3 }
  0xb4   : > { %v5814_v0 = vmov 0.0   ;;  %vm5815_vm0 = vmmov 0   ;;  %v5363_v1 = vld [vmem:[%s6772_s3] sm:$0xff]   ;;  %v5364_v2 = vld [vmem:[%s6772_s3 + $0x8] sm:$0xff]   ;;  %v5365_v3 = vld [vmem:[%s6772_s3 + $0x10] sm:$0xff]   ;;  %vm898_vm1 = vcmask 261120  }
  0xb5   : > { %5786 = vsyncadd (%p6813_p7), [#allocation9], 4294961920  ;;  %4758 = vmatprep.subr.bf16.mxu0 %v5814_v0  ;;  %4774 = vmatprep.mubr.msk.bf16.mxu0 %vm5815_vm0, %v5814_v0  ;;  %v5366_v4 = vld [vmem:[%s6772_s3 + $0x18] sm:$0xff]   ;;  %v5371_v5 = vld [vmem:[#allocation8] sm:$0xff]   ;;  %s6814_s20 = sld [smem:[#allocation21_spill]]  ;;  %s6815_s29 = sld [smem:[#allocation22_spill]] }
  0xb6   : > { %4778 = vmatprep.subr.bf16.mxu1 %v5814_v0  ;;  %4782 = vmatprep.mubr.msk.bf16.mxu1 %vm5815_vm0, %v5814_v0  ;;  %v5372_v6 = vld [vmem:[#allocation8 + $0x8] sm:$0xff]   ;;  %v5367_v7 = vld [vmem:[%s6772_s3 + $0x20] sm:$0xff]   ;;  %v5368_v8 = vld [vmem:[%s6772_s3 + $0x28] sm:$0xff]   ;;  %s4130_s13 = sshll.u32 %s6114_s2, 3  ;;  %s6816_s28 = sld [smem:[#allocation23_spill]] }
  0xb7   : > { %4759 = vmatpush3.bf16.msra.mxu0 %v5363_v1  ;;  %4779 = vmatpush3.bf16.msra.mxu1 %v5371_v5  ;;  %v5369_v9 = vld [vmem:[%s6772_s3 + $0x30] sm:$0xff]   ;;  %v5370_v10 = vld [vmem:[%s6772_s3 + $0x38] sm:$0xff]   ;;  %v776_v11 = vld [vmem:[%s6126_s16] sm:$0xf]  ;;  %s4356_s7 = sshll.u32 %s5903_s25, 7  ;;  %s6817_s30 = sld [smem:[#allocation24_spill]] }
  0xb8   : > { %4760 = vmatprep.subr.bf16.mxu0 %v5814_v0  ;;  %4780 = vmatprep.subr.bf16.mxu1 %v5814_v0  ;;  %v5373_v12 = vld [vmem:[#allocation7 + $0x40] sm:$0xff]   ;;  %v5379_v15 = vld [vmem:[#allocation7 + $0xc8] sm:$0xff]   ;;  %v5383_v17 = vld [vmem:[#allocation7 + $0xd0] sm:$0xff]   ;;  %s3981_s17 = scalar_lea.sflag [#allocation4], %s6114_s2  ;;  %p6818_p1 = scmp.ne.s32.totalorder %s6804_s12, 0 }
  0xb9   : > { %v5375_v13 = vld [vmem:[#allocation7 + $0xc0] sm:$0xff]   ;;  %v5380_v16 = vld [vmem:[#allocation7 + $0x88] sm:$0xff]   ;;  %v5384_v18 = vld [vmem:[#allocation7 + $0x90] sm:$0xff]  }
  0xba   : > { %v5376_v14 = vld [vmem:[#allocation7 + $0x80] sm:$0xff]   ;;  %v5387_v19 = vld [vmem:[#allocation7 + $0xd8] sm:$0xff]   ;;  %v5395_v23 = vld [vmem:[#allocation7 + $0xe8] sm:$0xff]  }
  0xbb   : > { %4761 = vmatpush3.bf16.msra.mxu0 %v5364_v2  ;;  %4781 = vmatpush3.bf16.msra.mxu1 %v5372_v6  ;;  %v5388_v20 = vld [vmem:[#allocation7 + $0x98] sm:$0xff]   ;;  %v5391_v21 = vld [vmem:[#allocation7 + $0xe0] sm:$0xff]   ;;  %v5396_v24 = vld [vmem:[#allocation7 + $0xa8] sm:$0xff]  }
  0xbc   : > { %4762 = vmatprep.subr.bf16.mxu0 %v5814_v0  ;;  %4372 = vmatprep.subr.bf16.mxu1 %v5373_v12  ;;  %v5392_v22 = vld [vmem:[#allocation7 + $0xa0] sm:$0xff]   ;;  %v5399_v25 = vld [vmem:[#allocation7 + $0xf0] sm:$0xff]   ;;  %v5403_v27 = vld [vmem:[#allocation7 + $0xf8] sm:$0xff]  }
  0xbd   : > { %v5400_v26 = vld [vmem:[#allocation7 + $0xb0] sm:$0xff]   ;;  %v5406_v28 = vld [vmem:[#allocation7 + $0xb8] sm:$0xff]   ;;  %v513_v29 = vld [vmem:[%s6118_s15 + $0x8] sm:$0xff]  ;;  %s6725_s9 = scalar_lea.hbm %s6817_s30, %s4356_s7 }
  0xbe   : > { %v4145_v30 = vcombine.high %v513_v29, %v513_v29  ;;  %v4144_v31 = vcombine.low %v513_v29, %v513_v29  ;;  %v5411_v32 = vld [vmem:[#allocation7 + $0x1c0] sm:$0xff]   ;;  %v5415_v34 = vld [vmem:[#allocation7 + $0x1c8] sm:$0xff]   ;;  %v5419_v36 = vld [vmem:[#allocation7 + $0x1d0] sm:$0xff]  }
  0xbf   : > { %4763 = vmatpush3.bf16.msra.mxu0 %v5365_v3  ;;  %v5412_v33 = vld [vmem:[#allocation7 + $0x180] sm:$0xff]   ;;  %v5416_v35 = vld [vmem:[#allocation7 + $0x188] sm:$0xff]   ;;  %v5420_v37 = vld [vmem:[#allocation7 + $0x190] sm:$0xff]  }
  0xc0   : > { %4764 = vmatprep.subr.bf16.mxu0 %v5814_v0  ;;  %v5423_v38 = vld [vmem:[#allocation7 + $0x1d8] sm:$0xff]   ;;  %v5427_v40 = vld [vmem:[#allocation7 + $0x1e0] sm:$0xff]   ;;  %v5431_v42 = vld [vmem:[#allocation7 + $0x1e8] sm:$0xff]  }
  0xc1   : > { %v5424_v39 = vld [vmem:[#allocation7 + $0x198] sm:$0xff]   ;;  %v5428_v41 = vld [vmem:[#allocation7 + $0x1a0] sm:$0xff]   ;;  %v5432_v43 = vld [vmem:[#allocation7 + $0x1a8] sm:$0xff]  }
  0xc2   : > { %v5435_v44 = vld [vmem:[#allocation7 + $0x1f0] sm:$0xff]   ;;  %v5439_v46 = vld [vmem:[#allocation7 + $0x1f8] sm:$0xff]   ;;  %v5447_v51 = vld [vmem:[#allocation7 + $0x2c0] sm:$0xff]  }
  0xc3   : > { %4765 = vmatpush3.bf16.msra.mxu0 %v5366_v4  ;;  %v5436_v45 = vld [vmem:[#allocation7 + $0x1b0] sm:$0xff]   ;;  %v5442_v47 = vld [vmem:[#allocation7 + $0x1b8] sm:$0xff]   ;;  %v5448_v52 = vld [vmem:[#allocation7 + $0x280] sm:$0xff]  }
  0xc4   : > { %4766 = vmatprep.subr.bf16.mxu0 %v5814_v0  ;;  %v515_v48 = vld [vmem:[%s6118_s15 + $0x18] sm:$0xff]  ;;  %v5451_v53 = vld [vmem:[#allocation7 + $0x2c8] sm:$0xff]   ;;  %v5459_v57 = vld [vmem:[#allocation7 + $0x2d8] sm:$0xff]  }
  0xc5   : > { %v4149_v49 = vcombine.high %v515_v48, %v515_v48  ;;  %v4148_v50 = vcombine.low %v515_v48, %v515_v48  ;;  %v5452_v54 = vld [vmem:[#allocation7 + $0x288] sm:$0xff]   ;;  %v5455_v55 = vld [vmem:[#allocation7 + $0x2d0] sm:$0xff]   ;;  %v5460_v58 = vld [vmem:[#allocation7 + $0x298] sm:$0xff]  }
  0xc6   : > { %v5456_v56 = vld [vmem:[#allocation7 + $0x290] sm:$0xff]   ;;  %v5463_v59 = vld [vmem:[#allocation7 + $0x2e0] sm:$0xff]   ;;  %v5467_v61 = vld [vmem:[#allocation7 + $0x2e8] sm:$0xff]  }
  0xc7   : > { %4767 = vmatpush3.bf16.msra.mxu0 %v5367_v7  ;;  %v5464_v60 = vld [vmem:[#allocation7 + $0x2a0] sm:$0xff]   ;;  %v5468_v62 = vld [vmem:[#allocation7 + $0x2a8] sm:$0xff]   ;;  %v5471_v63 = vld [vmem:[#allocation7 + $0x2f0] sm:$0xff]  }
  0xc8   : > { %4768 = vmatprep.subr.bf16.mxu0 %v5814_v0  ;;  %v5472_v1 = vld [vmem:[#allocation7 + $0x2b0] sm:$0xff]   ;;  %v5475_v2 = vld [vmem:[#allocation7 + $0x2f8] sm:$0xff]   ;;  %v517_v4 = vld [vmem:[%s6118_s15 + $0x28] sm:$0xff] }
  0xc9   : > { %v5478_v3 = vld [vmem:[#allocation7 + $0x2b8] sm:$0xff]   ;;  %v4153_v5 = vcombine.high %v517_v4, %v517_v4  ;;  %v4152_v6 = vcombine.low %v517_v4, %v517_v4  ;;  %v5483_v7 = vld [vmem:[#allocation7 + $0x3c0] sm:$0xff]   ;;  %v5492_v12 = vld [vmem:[#allocation7 + $0x390] sm:$0xff]  }
  0xca   : > { %v5377_v29 = vld [vmem:[#allocation7 + $0x48] sm:$0xff]   ;;  %v5397_v48 = vld [vmem:[#allocation7 + $0x70] sm:$0xff]   ;;  %v5422_v4 = vld [vmem:[#allocation7 + $0x118] sm:$0xff]  }
  0xcb   : > { %4769 = vmatpush3.bf16.msra.mxu0 %v5368_v8  ;;  %v5484_v8 = vld [vmem:[#allocation7 + $0x380] sm:$0xff]  }
  0xcc   : > { %4770 = vmatprep.subr.bf16.mxu0 %v5814_v0 }
  0xcf   : > { %4771 = vmatpush3.bf16.msra.mxu0 %v5369_v9  ;;  %v5487_v9 = vld [vmem:[#allocation7 + $0x3c8] sm:$0xff]  }
  0xd0   : > { %4772 = vmatprep.subr.bf16.mxu0 %v5814_v0 }
  0xd3   : > { %4773 = vmatpush3.bf16.msra.mxu0 %v5370_v10  ;;  %v5488_v10 = vld [vmem:[#allocation7 + $0x388] sm:$0xff]  }
  0xd4   : > { %4394 = vmatprep.subr.bf16.mxu0 %v5375_v13  ;;  %v5495_v13 = vld [vmem:[#allocation7 + $0x3d8] sm:$0xff]  }
  0xd6   : > { %4775 = vmatmul.mubr.bf16.vlgmr.msra.gmra.mrb[0].mxu0 %v776_v11  ;;  %v5491_v11 = vld [vmem:[#allocation7 + $0x3d0] sm:$0xff]  }
  0xd7   : > { %4395 = vmatpush3.bf16.msra.mxu0 %v5376_v14  ;;  %1838 = vmatprep.mubr.bf16.mxu0 %v4145_v30  ;;  %v5496_v14 = vld [vmem:[#allocation7 + $0x398] sm:$0xff]   ;;  %v519_v30 = vld [vmem:[%s6118_s15 + $0x38] sm:$0xff] }
  0xd8   : > { %4396 = vmatprep.subr.bf16.mxu0 %v5379_v15  ;;  %v5499_v15 = vld [vmem:[#allocation7 + $0x3e0] sm:$0xff]  }
  0xdb   : > { %4397 = vmatpush3.bf16.msra.mxu0 %v5380_v16  ;;  %v5500_v16 = vld [vmem:[#allocation7 + $0x3a0] sm:$0xff]  }
  0xdc   : > { %4398 = vmatprep.subr.bf16.mxu0 %v5383_v17  ;;  %v5503_v17 = vld [vmem:[#allocation7 + $0x3e8] sm:$0xff]  }
  0xdf   : > { %4399 = vmatpush3.bf16.msra.mxu0 %v5384_v18  ;;  %v5504_v18 = vld [vmem:[#allocation7 + $0x3a8] sm:$0xff]  }
  0xe0   : > { %4400 = vmatprep.subr.bf16.mxu0 %v5387_v19  ;;  %v5507_v19 = vld [vmem:[#allocation7 + $0x3f0] sm:$0xff]  }
  0xe3   : > { %4401 = vmatpush3.bf16.msra.mxu0 %v5388_v20  ;;  %v5508_v20 = vld [vmem:[#allocation7 + $0x3b0] sm:$0xff]  }
  0xe4   : > { %4402 = vmatprep.subr.bf16.mxu0 %v5391_v21  ;;  %v6183_v21 = vld [vmem:[%s6118_s15] sm:$0xff] }
  0xe7   : > { %4403 = vmatpush3.bf16.msra.mxu0 %v5392_v22  ;;  %v5511_v22 = vld [vmem:[#allocation7 + $0x3f8] sm:$0xff]  }
  0xe8   : > { %4404 = vmatprep.subr.bf16.mxu0 %v5395_v23 }
  0xeb   : > { %4405 = vmatpush3.bf16.msra.mxu0 %v5396_v24  ;;  %v5374_v24 = vld [vmem:[#allocation7] sm:$0xff]  }
  0xec   : > { %4406 = vmatprep.subr.bf16.mxu0 %v5399_v25  ;;  %v4143_v25 = vcombine.high %v6183_v21, %v6183_v21 }
  0xef   : > { %4407 = vmatpush3.bf16.msra.mxu0 %v5400_v26  ;;  %v5514_v26 = vld [vmem:[#allocation7 + $0x3b8] sm:$0xff]  }
  0xf0   : > { %4408 = vmatprep.subr.bf16.mxu0 %v5403_v27 }
  0xf3   : > { %4409 = vmatpush3.bf16.msra.mxu0 %v5406_v28 }
  0xf4   : > { %4438 = vmatprep.subr.bf16.mxu0 %v5411_v32  ;;  %v4157_v32 = vcombine.high %v519_v30, %v519_v30 }
  0xf6   : > { %1839 = vmatmul.mubr.bf16.vlgmr.msra.gmra.mrb[4].mxu0 %v4144_v31 }
  0xf7   : > { %4439 = vmatpush3.bf16.msra.mxu0 %v5412_v33  ;;  %1918 = vmatprep.mubr.bf16.mxu0 %v4149_v49  ;;  %v6223_v49 = vld [vmem:[%s6772_s3 + $0x20] sm:$0xff]  }
  0xf8   : > { %4440 = vmatprep.subr.bf16.mxu0 %v5415_v34  ;;  %v4156_v34 = vcombine.low %v519_v30, %v519_v30  ;;  %v5473_v30 = vld [vmem:[#allocation7 + $0x278] sm:$0xff]  }
  0xfb   : > { %4441 = vmatpush3.bf16.msra.mxu0 %v5416_v35  ;;  %v5378_v35 = vld [vmem:[#allocation7 + $0x8] sm:$0xff]  }
  0xfc   : > { %4442 = vmatprep.subr.bf16.mxu0 %v5419_v36  ;;  %v5381_v36 = vld [vmem:[#allocation7 + $0x50] sm:$0xff]  }
  0xff   : > { %4443 = vmatpush3.bf16.msra.mxu0 %v5420_v37  ;;  %v6193_v37 = vld [vmem:[%s6772_s3] sm:$0xff]  }
 0x100   : > { %4444 = vmatprep.subr.bf16.mxu0 %v5423_v38  ;;  %v5382_v38 = vld [vmem:[#allocation7 + $0x10] sm:$0xff]  }
 0x103   : > { %4445 = vmatpush3.bf16.msra.mxu0 %v5424_v39  ;;  %v5385_v39 = vld [vmem:[#allocation7 + $0x58] sm:$0xff]  }
 0x104   : > { %4446 = vmatprep.subr.bf16.mxu0 %v5427_v40  ;;  %v6202_v40 = vld [vmem:[%s6772_s3 + $0x8] sm:$0xff]  }
 0x107   : > { %4447 = vmatpush3.bf16.msra.mxu0 %v5428_v41  ;;  %v5386_v41 = vld [vmem:[#allocation7 + $0x18] sm:$0xff]  }
 0x108   : > { %4448 = vmatprep.subr.bf16.mxu0 %v5431_v42  ;;  %v5389_v42 = vld [vmem:[#allocation7 + $0x60] sm:$0xff]  }
 0x10b   : > { %4449 = vmatpush3.bf16.msra.mxu0 %v5432_v43  ;;  %v6209_v43 = vld [vmem:[%s6772_s3 + $0x10] sm:$0xff]  }
 0x10c   : > { %4450 = vmatprep.subr.bf16.mxu0 %v5435_v44  ;;  %v5390_v44 = vld [vmem:[#allocation7 + $0x20] sm:$0xff]  }
 0x10f   : > { %4451 = vmatpush3.bf16.msra.mxu0 %v5436_v45  ;;  %v5393_v45 = vld [vmem:[#allocation7 + $0x68] sm:$0xff]  }
 0x110   : > { %4452 = vmatprep.subr.bf16.mxu0 %v5439_v46  ;;  %v6216_v46 = vld [vmem:[%s6772_s3 + $0x18] sm:$0xff]  }
 0x113   : > { %4453 = vmatpush3.bf16.msra.mxu0 %v5442_v47  ;;  %v5394_v47 = vld [vmem:[#allocation7 + $0x28] sm:$0xff]  }
 0x114   : > { %4482 = vmatprep.subr.bf16.mxu0 %v5447_v51  ;;  %v5401_v51 = vld [vmem:[#allocation7 + $0x78] sm:$0xff]  }
 0x116   : > { %1919 = vmatmul.mubr.bf16.vlgmr.msra.gmra.mrb[8].mxu0 %v4148_v50  ;;  %v5398_v50 = vld [vmem:[#allocation7 + $0x30] sm:$0xff]  }
 0x117   : > { %4483 = vmatpush3.bf16.msra.mxu0 %v5448_v52  ;;  %1998 = vmatprep.mubr.bf16.mxu0 %v4153_v5  ;;  %v6230_v52 = vld [vmem:[%s6772_s3 + $0x28] sm:$0xff]  }
 0x118   : > { %4484 = vmatprep.subr.bf16.mxu0 %v5451_v53  ;;  %v5402_v53 = vld [vmem:[#allocation7 + $0x38] sm:$0xff]   ;;  %v5425_v5 = vld [vmem:[#allocation7 + $0x160] sm:$0xff]  }
 0x11b   : > { %4485 = vmatpush3.bf16.msra.mxu0 %v5452_v54  ;;  %v5407_v54 = vld [vmem:[#allocation7 + $0x140] sm:$0xff]  }
 0x11c   : > { %4486 = vmatprep.subr.bf16.mxu0 %v5455_v55  ;;  %v514_v55 = vld [vmem:[%s6118_s15 + $0x10] sm:$0xff] }
 0x11f   : > { %4487 = vmatpush3.bf16.msra.mxu0 %v5456_v56  ;;  %v4142_v56 = vcombine.low %v6183_v21, %v6183_v21  ;;  %v5454_v21 = vld [vmem:[#allocation7 + $0x210] sm:$0xff]  }
 0x120   : > { %4488 = vmatprep.subr.bf16.mxu0 %v5459_v57  ;;  %v6240_v57 = vld [vmem:[%s6772_s3 + $0x30] sm:$0xff]  }
 0x123   : > { %4489 = vmatpush3.bf16.msra.mxu0 %v5460_v58  ;;  %v5410_v58 = vld [vmem:[#allocation7 + $0x100] sm:$0xff]  }
 0x124   : > { %4490 = vmatprep.subr.bf16.mxu0 %v5463_v59  ;;  %v4147_v59 = vcombine.high %v514_v55, %v514_v55 }
 0x127   : > { %4491 = vmatpush3.bf16.msra.mxu0 %v5464_v60  ;;  %v5413_v60 = vld [vmem:[#allocation7 + $0x148] sm:$0xff]  }
 0x128   : > { %4492 = vmatprep.subr.bf16.mxu0 %v5467_v61  ;;  %v6247_v61 = vld [vmem:[%s6772_s3 + $0x38] sm:$0xff]  }
 0x12b   : > { %4493 = vmatpush3.bf16.msra.mxu0 %v5468_v62  ;;  %v2188_v62 = vld [vmem:[%s6126_s16 + $0x8] sm:$0xf] }
 0x12c   : > { %4494 = vmatprep.subr.bf16.mxu0 %v5471_v63  ;;  %v5414_v63 = vld [vmem:[#allocation7 + $0x108] sm:$0xff]  }
 0x12f   : > { %4495 = vmatpush3.bf16.msra.mxu0 %v5472_v1  ;;  %v5417_v1 = vld [vmem:[#allocation7 + $0x150] sm:$0xff]  }
 0x130   : > { %4496 = vmatprep.subr.bf16.mxu0 %v5475_v2  ;;  %v5418_v2 = vld [vmem:[#allocation7 + $0x110] sm:$0xff]  }
 0x133   : > { %4497 = vmatpush3.bf16.msra.mxu0 %v5478_v3  ;;  %v5421_v3 = vld [vmem:[#allocation7 + $0x158] sm:$0xff]  }
 0x134   : > { %4526 = vmatprep.subr.bf16.mxu0 %v5483_v7  ;;  %v5429_v7 = vld [vmem:[#allocation7 + $0x168] sm:$0xff]  }
 0x136   : > { %1999 = vmatmul.mubr.bf16.vlgmr.msra.gmra.mrb[12].mxu0 %v4152_v6  ;;  %v5426_v6 = vld [vmem:[#allocation7 + $0x120] sm:$0xff]  }
 0x137   : > { %4527 = vmatpush3.bf16.msra.mxu0 %v5484_v8  ;;  %2078 = vmatprep.mubr.bf16.mxu0 %v4157_v32  ;;  %v5430_v8 = vld [vmem:[#allocation7 + $0x128] sm:$0xff]   ;;  %v5479_v32 = vld [vmem:[#allocation7 + $0x340] sm:$0xff]  }
 0x138   : > { %4528 = vmatprep.subr.bf16.mxu0 %v5487_v9  ;;  %v5433_v9 = vld [vmem:[#allocation7 + $0x170] sm:$0xff]  }
 0x13b   : > { %4529 = vmatpush3.bf16.msra.mxu0 %v5488_v10  ;;  %v5434_v10 = vld [vmem:[#allocation7 + $0x130] sm:$0xff]  }
 0x13c   : > { %4530 = vmatprep.subr.bf16.mxu0 %v5491_v11  ;;  %v5437_v11 = vld [vmem:[#allocation7 + $0x178] sm:$0xff]  }
 0x13f   : > { %4531 = vmatpush3.bf16.msra.mxu0 %v5492_v12  ;;  %v5438_v12 = vld [vmem:[#allocation7 + $0x138] sm:$0xff]  }
 0x140   : > { %4532 = vmatprep.subr.bf16.mxu0 %v5495_v13  ;;  %v5443_v13 = vld [vmem:[#allocation7 + $0x240] sm:$0xff]  }
 0x143   : > { %4533 = vmatpush3.bf16.msra.mxu0 %v5496_v14  ;;  %v516_v14 = vld [vmem:[%s6118_s15 + $0x20] sm:$0xff] }
 0x144   : > { %4534 = vmatprep.subr.bf16.mxu0 %v5499_v15  ;;  %v4146_v15 = vcombine.low %v514_v55, %v514_v55 }
 0x147   : > { %4535 = vmatpush3.bf16.msra.mxu0 %v5500_v16  ;;  %v5446_v16 = vld [vmem:[#allocation7 + $0x200] sm:$0xff]  }
 0x148   : > { %4536 = vmatprep.subr.bf16.mxu0 %v5503_v17  ;;  %v4151_v17 = vcombine.high %v516_v14, %v516_v14 }
 0x14b   : > { %4537 = vmatpush3.bf16.msra.mxu0 %v5504_v18  ;;  %v5449_v18 = vld [vmem:[#allocation7 + $0x248] sm:$0xff]  }
 0x14c   : > { %4538 = vmatprep.subr.bf16.mxu0 %v5507_v19  ;;  %v5450_v19 = vld [vmem:[#allocation7 + $0x208] sm:$0xff]  }
 0x14f   : > { %4539 = vmatpush3.bf16.msra.mxu0 %v5508_v20  ;;  %v5453_v20 = vld [vmem:[#allocation7 + $0x250] sm:$0xff]  }
 0x150   : > { %4540 = vmatprep.subr.bf16.mxu0 %v5511_v22  ;;  %v5457_v22 = vld [vmem:[#allocation7 + $0x258] sm:$0xff]  }
 0x153   : > { %4541 = vmatpush3.bf16.msra.mxu0 %v5514_v26  ;;  %v5465_v26 = vld [vmem:[#allocation7 + $0x268] sm:$0xff]  }
 0x154   : > { %4814 = vmatprep.subr.bf16.mxu0 %v5814_v0 }
 0x156   : > { %2079 = vmatmul.mubr.bf16.vlgmr.msra.gmra.mrb[16].mxu0 %v4156_v34  ;;  %v4150_v34 = vcombine.low %v516_v14, %v516_v14 }
 0x157   : > { %4815 = vmatpush3.bf16.msra.mxu0 %v6193_v37  ;;  %4830 = vmatprep.mubr.msk.bf16.mxu0 %vm5815_vm0, %v5814_v0 }
 0x158   : > { %4816 = vmatprep.subr.bf16.mxu0 %v5814_v0 }
 0x15b   : > { %4817 = vmatpush3.bf16.msra.mxu0 %v6202_v40 }
 0x15c   : > { %4818 = vmatprep.subr.bf16.mxu0 %v5814_v0 }
 0x15f   : > { %4819 = vmatpush3.bf16.msra.mxu0 %v6209_v43 }
 0x160   : > { %4820 = vmatprep.subr.bf16.mxu0 %v5814_v0 }
 0x163   : > { %4821 = vmatpush3.bf16.msra.mxu0 %v6216_v46 }
 0x164   : > { %4822 = vmatprep.subr.bf16.mxu0 %v5814_v0 }
 0x167   : > { %4823 = vmatpush3.bf16.msra.mxu0 %v6223_v49 }
 0x168   : > { %4824 = vmatprep.subr.bf16.mxu0 %v5814_v0 }
 0x16b   : > { %4825 = vmatpush3.bf16.msra.mxu0 %v6230_v52 }
 0x16c   : > { %4826 = vmatprep.subr.bf16.mxu0 %v5814_v0 }
 0x16f   : > { %4827 = vmatpush3.bf16.msra.mxu0 %v6240_v57 }
 0x170   : > { %4828 = vmatprep.subr.bf16.mxu0 %v5814_v0 }
 0x173   : > { %4829 = vmatpush3.bf16.msra.mxu0 %v6247_v61 }
 0x174   : > { %4862 = vmatprep.subr.bf16.mxu0 %v5814_v0 }
 0x176   : > { %4831 = vmatmul.mubr.bf16.vlgmr.msra.gmra.mrb[20].mxu0 %v2188_v62 }
 0x177   : > { %4866 = vmatprep.mubr.msk.bf16.mxu0 %vm5815_vm0, %v5814_v0 }
 0x1a9   : > { %v875_v23 = vpop.f32.mrb[0].mxu0 }
 0x1aa   : > { %v881_v27 = vpack.c.bf16 %v875_v23, %v875_v23  ;;  %v4776_v28 = vpop.f32.mrb[1].mxu0  ;;  %v5458_v23 = vld [vmem:[#allocation7 + $0x218] sm:$0xff]  }
 0x1ab   : > { %v878_v31 = vpop.f32.mrb[2].mxu0  ;;  %v5469_v28 = vld [vmem:[#allocation7 + $0x270] sm:$0xff]  }
 0x1ac   : > { %v4777_v33 = vpop.f32.mrb[3].mxu0  ;;  %4783 = vmatmul.mubr.msk.bf16.vlgmr.msra.gmra.mrb[0].mxu1 %vm898_vm1, %v881_v27  ;;  %v5466_v27 = vld [vmem:[#allocation7 + $0x228] sm:$0xff]   ;;  %v5474_v31 = vld [vmem:[#allocation7 + $0x238] sm:$0xff]  }
 0x1ad   : > { %4373 = vmatpush3.bf16.msra.mxu1 %v5374_v24  ;;  %1798 = vmatprep.mubr.bf16.mxu1 %v4143_v25  ;;  %v5461_v24 = vld [vmem:[#allocation7 + $0x260] sm:$0xff]   ;;  %v518_v33 = vld [vmem:[%s6118_s15 + $0x30] sm:$0xff]  ;;  %s510_s15 = scalar_lea.vmem [#allocation11], %s4130_s13 }
 0x1ae   : > { %4374 = vmatprep.subr.bf16.mxu1 %v5377_v29  ;;  %v5462_v25 = vld [vmem:[#allocation7 + $0x220] sm:$0xff]   ;;  %v5470_v29 = vld [vmem:[#allocation7 + $0x230] sm:$0xff]  }
 0x1b1   : > { %4375 = vmatpush3.bf16.msra.mxu1 %v5378_v35  ;;  %v5482_v35 = vld [vmem:[#allocation7 + $0x300] sm:$0xff]  }
 0x1b2   : > { %4376 = vmatprep.subr.bf16.mxu1 %v5381_v36  ;;  %v4155_v36 = vcombine.high %v518_v33, %v518_v33 }
 0x1b5   : > { %4377 = vmatpush3.bf16.msra.mxu1 %v5382_v38  ;;  %v5485_v38 = vld [vmem:[#allocation7 + $0x348] sm:$0xff]  }
 0x1b6   : > { %4378 = vmatprep.subr.bf16.mxu1 %v5385_v39  ;;  %v5486_v39 = vld [vmem:[#allocation7 + $0x308] sm:$0xff]  }
 0x1b9   : > { %4379 = vmatpush3.bf16.msra.mxu1 %v5386_v41  ;;  %v5489_v41 = vld [vmem:[#allocation7 + $0x350] sm:$0xff]  }
 0x1ba   : > { %4380 = vmatprep.subr.bf16.mxu1 %v5389_v42  ;;  %v5490_v42 = vld [vmem:[#allocation7 + $0x310] sm:$0xff]  }
 0x1bd   : > { %4381 = vmatpush3.bf16.msra.mxu1 %v5390_v44  ;;  %v5493_v44 = vld [vmem:[#allocation7 + $0x358] sm:$0xff]  }
 0x1be   : > { %4382 = vmatprep.subr.bf16.mxu1 %v5393_v45  ;;  %v5494_v45 = vld [vmem:[#allocation7 + $0x318] sm:$0xff]  }
 0x1c1   : > { %4383 = vmatpush3.bf16.msra.mxu1 %v5394_v47  ;;  %v5497_v47 = vld [vmem:[#allocation7 + $0x360] sm:$0xff]  }
 0x1c2   : > { %4384 = vmatprep.subr.bf16.mxu1 %v5397_v48  ;;  %v5498_v48 = vld [vmem:[#allocation7 + $0x320] sm:$0xff]  }
 0x1c5   : > { %4385 = vmatpush3.bf16.msra.mxu1 %v5398_v50  ;;  %v5501_v50 = vld [vmem:[#allocation7 + $0x368] sm:$0xff]  }
 0x1c6   : > { %4386 = vmatprep.subr.bf16.mxu1 %v5401_v51  ;;  %v5502_v51 = vld [vmem:[#allocation7 + $0x328] sm:$0xff]  }
 0x1c9   : > { %4387 = vmatpush3.bf16.msra.mxu1 %v5402_v53  ;;  %v5505_v53 = vld [vmem:[#allocation7 + $0x370] sm:$0xff]   ;;  %v4410_v55 = vpop.f32.mrb[4].mxu0 }
 0x1ca   : > { %4416 = vmatprep.subr.bf16.mxu1 %v5407_v54  ;;  %v5506_v54 = vld [vmem:[#allocation7 + $0x330] sm:$0xff]  }
 0x1cc   : > { %1799 = vmatmul.mubr.bf16.vlgmr.msra.gmra.mrb[4].mxu1 %v4142_v56  ;;  %v5509_v56 = vld [vmem:[#allocation7 + $0x378] sm:$0xff]  }
 0x1cd   : > { %4417 = vmatpush3.bf16.msra.mxu1 %v5410_v58  ;;  %1878 = vmatprep.mubr.bf16.mxu1 %v4147_v59  ;;  %v4411_v58 = vpop.f32.mrb[5].mxu0 }
 0x1ce   : > { %4418 = vmatprep.subr.bf16.mxu1 %v5413_v60  ;;  %v6256_v59 = vadd.f32 %v4411_v58, %v4410_v55  ;;  %v4413_v60 = vpop.f32.mrb[6].mxu0 }
 0x1cf   : > { %v4414_v62 = vpop.f32.mrb[7].mxu0 }
 0x1d1   : > { %4419 = vmatpush3.bf16.msra.mxu1 %v5414_v63  ;;  %v5510_v63 = vld [vmem:[#allocation7 + $0x338] sm:$0xff]  }
 0x1d2   : > { %4420 = vmatprep.subr.bf16.mxu1 %v5417_v1  ;;  %v4154_v1 = vcombine.low %v518_v33, %v518_v33 }
 0x1d5   : > { %4421 = vmatpush3.bf16.msra.mxu1 %v5418_v2 }
 0x1d6   : > { %4422 = vmatprep.subr.bf16.mxu1 %v5421_v3 }
 0x1d9   : > { %4423 = vmatpush3.bf16.msra.mxu1 %v5422_v4 }
 0x1da   : > { %4424 = vmatprep.subr.bf16.mxu1 %v5425_v5 }
 0x1dd   : > { %4425 = vmatpush3.bf16.msra.mxu1 %v5426_v6 }
 0x1de   : > { %4426 = vmatprep.subr.bf16.mxu1 %v5429_v7  ;;  %v2086_v7 = vld [vmem:[%s6126_s16 + $0x4] sm:$0xf] }
 0x1e1   : > { %4427 = vmatpush3.bf16.msra.mxu1 %v5430_v8 }
 0x1e2   : > { %4428 = vmatprep.subr.bf16.mxu1 %v5433_v9 }
 0x1e5   : > { %4429 = vmatpush3.bf16.msra.mxu1 %v5434_v10 }
 0x1e6   : > { %4430 = vmatprep.subr.bf16.mxu1 %v5437_v11 }
 0x1e9   : > { %4431 = vmatpush3.bf16.msra.mxu1 %v5438_v12  ;;  %v4454_v2 = vpop.f32.mrb[8].mxu0 }
 0x1ea   : > { %4460 = vmatprep.subr.bf16.mxu1 %v5443_v13  ;;  %v4455_v3 = vpop.f32.mrb[9].mxu0 }
 0x1eb   : > { %v4456_v4 = vadd.f32 %v4455_v3, %v4454_v2  ;;  %v4457_v5 = vpop.f32.mrb[10].mxu0  ;;  %v5519_v2 = vld [vmem:[#allocation8 + $0x20] sm:$0xff]  }
 0x1ec   : > { %1879 = vmatmul.mubr.bf16.vlgmr.msra.gmra.mrb[8].mxu1 %v4146_v15  ;;  %v4458_v6 = vpop.f32.mrb[11].mxu0 }
 0x1ed   : > { %4461 = vmatpush3.bf16.msra.mxu1 %v5446_v16  ;;  %1958 = vmatprep.mubr.bf16.mxu1 %v4151_v17 }
 0x1ee   : > { %4462 = vmatprep.subr.bf16.mxu1 %v5449_v18 }
 0x1f1   : > { %4463 = vmatpush3.bf16.msra.mxu1 %v5450_v19  ;;  %v5517_v19 = vld [vmem:[#allocation8 + $0x10] sm:$0xff]  }
 0x1f2   : > { %4464 = vmatprep.subr.bf16.mxu1 %v5453_v20 }
 0x1f5   : > { %4465 = vmatpush3.bf16.msra.mxu1 %v5454_v21 }
 0x1f6   : > { %4466 = vmatprep.subr.bf16.mxu1 %v5457_v22 }
 0x1f9   : > { %4467 = vmatpush3.bf16.msra.mxu1 %v5458_v23  ;;  %v5518_v23 = vld [vmem:[#allocation8 + $0x18] sm:$0xff]  }
 0x1fa   : > { %4468 = vmatprep.subr.bf16.mxu1 %v5461_v24 }
 0x1fd   : > { %4469 = vmatpush3.bf16.msra.mxu1 %v5462_v25 }
 0x1fe   : > { %4470 = vmatprep.subr.bf16.mxu1 %v5465_v26 }
 0x201   : > { %4471 = vmatpush3.bf16.msra.mxu1 %v5466_v27 }
 0x202   : > { %4472 = vmatprep.subr.bf16.mxu1 %v5469_v28 }
 0x205   : > { %4473 = vmatpush3.bf16.msra.mxu1 %v5470_v29 }
 0x206   : > { %4474 = vmatprep.subr.bf16.mxu1 %v5473_v30 }
 0x209   : > { %4475 = vmatpush3.bf16.msra.mxu1 %v5474_v31  ;;  %v4498_v8 = vpop.f32.mrb[12].mxu0 }
 0x20a   : > { %4504 = vmatprep.subr.bf16.mxu1 %v5479_v32  ;;  %v4499_v9 = vpop.f32.mrb[13].mxu0 }
 0x20b   : > { %v4500_v10 = vadd.f32 %v4499_v9, %v4498_v8  ;;  %v4501_v11 = vpop.f32.mrb[14].mxu0  ;;  %v2290_v9 = vld [vmem:[%s6126_s16 + $0xc] sm:$0xf] }
 0x20c   : > { %1959 = vmatmul.mubr.bf16.vlgmr.msra.gmra.mrb[12].mxu1 %v4150_v34  ;;  %v4502_v12 = vpop.f32.mrb[15].mxu0  ;;  %v5522_v11 = vld [vmem:[#allocation8 + $0x38] sm:$0xff]  }
 0x20d   : > { %4505 = vmatpush3.bf16.msra.mxu1 %v5482_v35  ;;  %2038 = vmatprep.mubr.bf16.mxu1 %v4155_v36 }
 0x20e   : > { %4506 = vmatprep.subr.bf16.mxu1 %v5485_v38 }
 0x211   : > { %4507 = vmatpush3.bf16.msra.mxu1 %v5486_v39 }
 0x212   : > { %4508 = vmatprep.subr.bf16.mxu1 %v5489_v41 }
 0x215   : > { %4509 = vmatpush3.bf16.msra.mxu1 %v5490_v42 }
 0x216   : > { %4510 = vmatprep.subr.bf16.mxu1 %v5493_v44 }
 0x219   : > { %4511 = vmatpush3.bf16.msra.mxu1 %v5494_v45 }
 0x21a   : > { %4512 = vmatprep.subr.bf16.mxu1 %v5497_v47 }
 0x21d   : > { %4513 = vmatpush3.bf16.msra.mxu1 %v5498_v48 }
 0x21e   : > { %4514 = vmatprep.subr.bf16.mxu1 %v5501_v50 }
 0x221   : > { %4515 = vmatpush3.bf16.msra.mxu1 %v5502_v51 }
 0x222   : > { %4516 = vmatprep.subr.bf16.mxu1 %v5505_v53 }
 0x225   : > { %4517 = vmatpush3.bf16.msra.mxu1 %v5506_v54 }
 0x226   : > { %4518 = vmatprep.subr.bf16.mxu1 %v5509_v56 }
 0x229   : > { %4519 = vmatpush3.bf16.msra.mxu1 %v5510_v63  ;;  %v4542_v17 = vpop.f32.mrb[16].mxu0 }
 0x22a   : > { %4786 = vmatprep.subr.bf16.mxu1 %v5814_v0  ;;  %v4543_v18 = vpop.f32.mrb[17].mxu0 }
 0x22b   : > { %v4544_v20 = vadd.f32 %v4543_v18, %v4542_v17  ;;  %v4545_v21 = vpop.f32.mrb[18].mxu0 }
 0x22c   : > { %2039 = vmatmul.mubr.bf16.vlgmr.msra.gmra.mrb[16].mxu1 %v4154_v1  ;;  %v4546_v22 = vpop.f32.mrb[19].mxu0 }
 0x22d   : > { %4787 = vmatpush3.bf16.msra.mxu1 %v6193_v37  ;;  %4802 = vmatprep.mubr.msk.bf16.mxu1 %vm5815_vm0, %v5814_v0 }
 0x22e   : > { %4788 = vmatprep.subr.bf16.mxu1 %v5814_v0 }
 0x231   : > { %4789 = vmatpush3.bf16.msra.mxu1 %v6202_v40 }
 0x232   : > { %4790 = vmatprep.subr.bf16.mxu1 %v5814_v0 }
 0x235   : > { %4791 = vmatpush3.bf16.msra.mxu1 %v6209_v43 }
 0x236   : > { %4792 = vmatprep.subr.bf16.mxu1 %v5814_v0 }
 0x239   : > { %4793 = vmatpush3.bf16.msra.mxu1 %v6216_v46 }
 0x23a   : > { %4794 = vmatprep.subr.bf16.mxu1 %v5814_v0 }
 0x23d   : > { %4795 = vmatpush3.bf16.msra.mxu1 %v6223_v49 }
 0x23e   : > { %4796 = vmatprep.subr.bf16.mxu1 %v5814_v0 }
 0x241   : > { %4797 = vmatpush3.bf16.msra.mxu1 %v6230_v52 }
 0x242   : > { %4798 = vmatprep.subr.bf16.mxu1 %v5814_v0 }
 0x245   : > { %4799 = vmatpush3.bf16.msra.mxu1 %v6240_v57 }
 0x246   : > { %4800 = vmatprep.subr.bf16.mxu1 %v5814_v0 }
 0x249   : > { %4801 = vmatpush3.bf16.msra.mxu1 %v6247_v61  ;;  %v2223_v30 = vpop.f32.mrb[20].mxu0 }
 0x24a   : > { %4806 = vmatprep.subr.bf16.mxu1 %v5814_v0  ;;  %v4832_v31 = vpop.f32.mrb[21].mxu0  ;;  %v2229_v8 = vpack.c.bf16 %v2223_v30, %v2223_v30 }
 0x24b   : > { %v2226_v33 = vpop.f32.mrb[22].mxu0 }
 0x24c   : > { %4803 = vmatmul.mubr.bf16.vlgmr.msra.gmra.mrb[20].mxu1 %v2086_v7  ;;  %v4833_v34 = vpop.f32.mrb[23].mxu0  ;;  %v5520_v7 = vld [vmem:[#allocation8 + $0x28] sm:$0xff]  }
 0x24d   : > { %4810 = vmatprep.mubr.msk.bf16.mxu1 %vm5815_vm0, %v5814_v0  ;;  %4807 = vmatpush3.bf16.msra.mxu1 %v5517_v19 }
 0x24e   : > { %4808 = vmatprep.subr.bf16.mxu1 %v5814_v0 }
 0x251   : > { %4809 = vmatpush3.bf16.msra.mxu1 %v5518_v23 }
 0x252   : > { %4834 = vmatprep.subr.bf16.mxu1 %v5814_v0 }
 0x27f   : > { %v936_v13 = vpop.f32.mrb[0].mxu1 }
 0x280   : > { %v4784_v14 = vpop.f32.mrb[1].mxu1 }
 0x281   : > { %v939_v15 = vpop.f32.mrb[2].mxu1 }
 0x282   : > { %v4785_v16 = vpop.f32.mrb[3].mxu1 }
 0x29f   : > { %v4388_v24 = vpop.f32.mrb[4].mxu1 }
 0x2a0   : > { %v4389_v25 = vpop.f32.mrb[5].mxu1 }
 0x2a1   : > { %v4390_v26 = vadd.f32 %v4389_v25, %v4388_v24  ;;  %v4391_v27 = vpop.f32.mrb[6].mxu1 }
 0x2a2   : > { %v4392_v28 = vpop.f32.mrb[7].mxu1  ;;  %v2392_v27 = vld [vmem:[%s6126_s16 + $0x10] sm:$0xf] }
 0x2a3   : > { %v1801_v29 = vadd.f32 %v4390_v26, %v936_v13  ;;  %v5523_v28 = vld [vmem:[#allocation8 + $0x40] sm:$0xff]  }
 0x2a5   : > { %v1841_v32 = vadd.f32 %v6256_v59, %v1801_v29  ;;  %v5524_v29 = vld [vmem:[#allocation8 + $0x48] sm:$0xff]  }
 0x2bf   : > { %v4432_v35 = vpop.f32.mrb[8].mxu1 }
 0x2c0   : > { %v4433_v36 = vpop.f32.mrb[9].mxu1 }
 0x2c1   : > { %v4434_v38 = vadd.f32 %v4433_v36, %v4432_v35  ;;  %v4435_v39 = vpop.f32.mrb[10].mxu1 }
 0x2c2   : > { %v4436_v41 = vpop.f32.mrb[11].mxu1 }
 0x2c3   : > { %v1881_v42 = vadd.f32 %v4434_v38, %v1841_v32 }
 0x2c5   : > { %v1921_v44 = vadd.f32 %v4456_v4, %v1881_v42  ;;  %v2494_v42 = vld [vmem:[%s6126_s16 + $0x14] sm:$0xf] }
 0x2df   : > { %v4476_v45 = vpop.f32.mrb[12].mxu1 }
 0x2e0   : > { %v4477_v47 = vpop.f32.mrb[13].mxu1 }
 0x2e1   : > { %v4478_v48 = vadd.f32 %v4477_v47, %v4476_v45  ;;  %v4479_v50 = vpop.f32.mrb[14].mxu1  ;;  %v5526_v45 = vld [vmem:[#allocation8 + $0x58] sm:$0xff]  }
 0x2e2   : > { %v4480_v51 = vpop.f32.mrb[15].mxu1 }
 0x2e3   : > { %v1961_v53 = vadd.f32 %v4478_v48, %v1921_v44  ;;  %v5525_v44 = vld [vmem:[#allocation8 + $0x50] sm:$0xff]  }
 0x2e5   : > { %v2001_v54 = vadd.f32 %v4500_v10, %v1961_v53  ;;  %v5521_v10 = vld [vmem:[#allocation8 + $0x30] sm:$0xff]  }
 0x2e6   : > { %4863 = vmatpush3.bf16.msra.mxu0 %v5521_v10 }
 0x2e7   : > { %4864 = vmatprep.subr.bf16.mxu0 %v5814_v0 }
 0x2ea   : > { %4865 = vmatpush3.bf16.msra.mxu0 %v5522_v11  ;;  %v2698_v11 = vld [vmem:[%s6126_s16 + $0x1c] sm:$0xf] }
 0x2eb   : > { %4870 = vmatprep.subr.bf16.mxu0 %v5814_v0 }
 0x2ff   : > { %v4520_v55 = vpop.f32.mrb[16].mxu1 }
 0x300   : > { %v4521_v56 = vpop.f32.mrb[17].mxu1 }
 0x301   : > { %v4522_v58 = vadd.f32 %v4521_v56, %v4520_v55  ;;  %v4523_v59 = vpop.f32.mrb[18].mxu1 }
 0x302   : > { %v4524_v60 = vpop.f32.mrb[19].mxu1 }
 0x303   : > { %v2041_v62 = vadd.f32 %v4522_v58, %v2001_v54  ;;  %v2596_v60 = vld [vmem:[%s6126_s16 + $0x18] sm:$0xf] }
 0x305   : > { %v2081_v63 = vadd.f32 %v4544_v20, %v2041_v62  ;;  %v5527_v62 = vld [vmem:[#allocation8 + $0x60] sm:$0xff]  }
 0x31f   : > { %v2121_v1 = vpop.f32.mrb[20].mxu1 }
 0x320   : > { %v2127_v3 = vpack.c.bf16 %v2121_v1, %v2121_v1  ;;  %v4804_v5 = vpop.f32.mrb[21].mxu1 }
 0x321   : > { %v2124_v6 = vpop.f32.mrb[22].mxu1 }
 0x322   : > { %v4805_v4 = vpop.f32.mrb[23].mxu1  ;;  %4811 = vmatmul.mubr.msk.bf16.vlgmr.msra.gmra.mrb[24].mxu1 %vm898_vm1, %v2127_v3 }
 0x323   : > { %4835 = vmatpush3.bf16.msra.mxu1 %v5519_v2  ;;  %4838 = vmatprep.mubr.msk.bf16.mxu1 %vm5815_vm0, %v5814_v0 }
 0x324   : > { %4836 = vmatprep.subr.bf16.mxu1 %v5814_v0 }
 0x327   : > { %4837 = vmatpush3.bf16.msra.mxu1 %v5520_v7 }
 0x328   : > { %4842 = vmatprep.subr.bf16.mxu1 %v5814_v0 }
 0x32a   : > { %4839 = vmatmul.mubr.msk.bf16.vlgmr.msra.gmra.mrb[28].mxu1 %vm898_vm1, %v2229_v8 }
 0x32b   : > { %4843 = vmatpush3.bf16.msra.mxu1 %v6193_v37  ;;  %4858 = vmatprep.mubr.msk.bf16.mxu1 %vm5815_vm0, %v5814_v0 }
 0x32c   : > { %4844 = vmatprep.subr.bf16.mxu1 %v5814_v0 }
 0x32f   : > { %4845 = vmatpush3.bf16.msra.mxu1 %v6202_v40 }
 0x330   : > { %4846 = vmatprep.subr.bf16.mxu1 %v5814_v0 }
 0x333   : > { %4847 = vmatpush3.bf16.msra.mxu1 %v6209_v43 }
 0x334   : > { %4848 = vmatprep.subr.bf16.mxu1 %v5814_v0 }
 0x337   : > { %4849 = vmatpush3.bf16.msra.mxu1 %v6216_v46 }
 0x338   : > { %4850 = vmatprep.subr.bf16.mxu1 %v5814_v0 }
 0x33b   : > { %4851 = vmatpush3.bf16.msra.mxu1 %v6223_v49 }
 0x33c   : > { %4852 = vmatprep.subr.bf16.mxu1 %v5814_v0 }
 0x33f   : > { %4853 = vmatpush3.bf16.msra.mxu1 %v6230_v52 }
 0x340   : > { %4854 = vmatprep.subr.bf16.mxu1 %v5814_v0 }
 0x343   : > { %4855 = vmatpush3.bf16.msra.mxu1 %v6240_v57 }
 0x344   : > { %4856 = vmatprep.subr.bf16.mxu1 %v5814_v0 }
 0x347   : > { %4857 = vmatpush3.bf16.msra.mxu1 %v6247_v61 }
 0x348   : > { %4890 = vmatprep.subr.bf16.mxu1 %v5814_v0 }
 0x34a   : > { %4859 = vmatmul.mubr.bf16.vlgmr.msra.gmra.mrb[32].mxu1 %v2290_v9 }
 0x34b   : > { %4894 = vmatprep.mubr.msk.bf16.mxu1 %vm5815_vm0, %v5814_v0  ;;  %4891 = vmatpush3.bf16.msra.mxu1 %v5523_v28 }
 0x34c   : > { %4892 = vmatprep.subr.bf16.mxu1 %v5814_v0 }
 0x34f   : > { %4893 = vmatpush3.bf16.msra.mxu1 %v5524_v29 }
 0x350   : > { %4898 = vmatprep.subr.bf16.mxu1 %v5814_v0 }
 0x3f5   : > { %v2181_v12 = vpop.f32.mrb[24].mxu1 }
 0x3f6   : > { %v2187_v13 = vadd.f32 %v2181_v12, %v2081_v63  ;;  %v4812_v14 = vpop.f32.mrb[25].mxu1  ;;  %v5528_v63 = vld [vmem:[#allocation8 + $0x68] sm:$0xff]   ;;  %v5529_v12 = vld [vmem:[#allocation8 + $0x70] sm:$0xff]  }
 0x3f7   : > { %v2184_v15 = vpop.f32.mrb[26].mxu1 }
 0x3f8   : > { %v4813_v16 = vpop.f32.mrb[27].mxu1 }
 0x3fd   : > { %v2283_v17 = vpop.f32.mrb[28].mxu1 }
 0x3fe   : > { %v2289_v18 = vadd.f32 %v2283_v17, %v2187_v13  ;;  %v4840_v19 = vpop.f32.mrb[29].mxu1  ;;  %v5530_v13 = vld [vmem:[#allocation8 + $0x78] sm:$0xff]  }
 0x3ff   : > { %v2286_v20 = vpop.f32.mrb[30].mxu1 }
 0x400   : > { %v4841_v21 = vpop.f32.mrb[31].mxu1 }
 0x41d   : > { %v2325_v22 = vpop.f32.mrb[32].mxu1 }
 0x41e   : > { %v2331_v23 = vpack.c.bf16 %v2325_v22, %v2325_v22  ;;  %v4860_v24 = vpop.f32.mrb[33].mxu1 }
 0x41f   : > { %v2328_v25 = vpop.f32.mrb[34].mxu1  ;;  %v2800_v24 = vld [vmem:[%s6126_s16 + $0x20] sm:$0xf] }
 0x420   : > { %v4861_v26 = vpop.f32.mrb[35].mxu1  ;;  %4867 = vmatmul.mubr.msk.bf16.vlgmr.msra.gmra.mrb[24].mxu0 %vm898_vm1, %v2331_v23  ;;  %v5531_v25 = vld [vmem:[#allocation8 + $0x80] sm:$0xff]  }
 0x421   : > { %4871 = vmatpush3.bf16.msra.mxu0 %v6193_v37  ;;  %4886 = vmatprep.mubr.msk.bf16.mxu0 %vm5815_vm0, %v5814_v0  ;;  %v5532_v26 = vld [vmem:[#allocation8 + $0x88] sm:$0xff]  }
 0x422   : > { %4872 = vmatprep.subr.bf16.mxu0 %v5814_v0 }
 0x425   : > { %4873 = vmatpush3.bf16.msra.mxu0 %v6202_v40 }
 0x426   : > { %4874 = vmatprep.subr.bf16.mxu0 %v5814_v0 }
 0x429   : > { %4875 = vmatpush3.bf16.msra.mxu0 %v6209_v43 }
 0x42a   : > { %4876 = vmatprep.subr.bf16.mxu0 %v5814_v0 }
 0x42d   : > { %4877 = vmatpush3.bf16.msra.mxu0 %v6216_v46 }
 0x42e   : > { %4878 = vmatprep.subr.bf16.mxu0 %v5814_v0 }
 0x431   : > { %4879 = vmatpush3.bf16.msra.mxu0 %v6223_v49 }
 0x432   : > { %4880 = vmatprep.subr.bf16.mxu0 %v5814_v0 }
 0x435   : > { %4881 = vmatpush3.bf16.msra.mxu0 %v6230_v52 }
 0x436   : > { %4882 = vmatprep.subr.bf16.mxu0 %v5814_v0 }
 0x439   : > { %4883 = vmatpush3.bf16.msra.mxu0 %v6240_v57 }
 0x43a   : > { %4884 = vmatprep.subr.bf16.mxu0 %v5814_v0 }
 0x43d   : > { %4885 = vmatpush3.bf16.msra.mxu0 %v6247_v61 }
 0x43e   : > { %4918 = vmatprep.subr.bf16.mxu0 %v5814_v0 }
 0x440   : > { %4887 = vmatmul.mubr.bf16.vlgmr.msra.gmra.mrb[28].mxu0 %v2392_v27 }
 0x441   : > { %4922 = vmatprep.mubr.msk.bf16.mxu0 %vm5815_vm0, %v5814_v0  ;;  %4919 = vmatpush3.bf16.msra.mxu0 %v5525_v44 }
 0x442   : > { %4920 = vmatprep.subr.bf16.mxu0 %v5814_v0 }
 0x445   : > { %4921 = vmatpush3.bf16.msra.mxu0 %v5526_v45 }
 0x446   : > { %4926 = vmatprep.subr.bf16.mxu0 %v5814_v0 }
 0x4f3   : > { %v2385_v30 = vpop.f32.mrb[24].mxu0 }
 0x4f4   : > { %v2391_v31 = vadd.f32 %v2385_v30, %v2289_v18  ;;  %v4868_v32 = vpop.f32.mrb[25].mxu0 }
 0x4f5   : > { %v2388_v33 = vpop.f32.mrb[26].mxu0 }
 0x4f6   : > { %v4869_v34 = vpop.f32.mrb[27].mxu0 }
 0x513   : > { %v2427_v35 = vpop.f32.mrb[28].mxu0 }
 0x514   : > { %v2433_v36 = vpack.c.bf16 %v2427_v35, %v2427_v35  ;;  %v4888_v38 = vpop.f32.mrb[29].mxu0 }
 0x515   : > { %v2430_v39 = vpop.f32.mrb[30].mxu0  ;;  %v5534_v38 = vld [vmem:[#allocation8 + $0x98] sm:$0xff]  }
 0x516   : > { %v4889_v41 = vpop.f32.mrb[31].mxu0  ;;  %4895 = vmatmul.mubr.msk.bf16.vlgmr.msra.gmra.mrb[36].mxu1 %vm898_vm1, %v2433_v36 }
 0x517   : > { %4899 = vmatpush3.bf16.msra.mxu1 %v6193_v37  ;;  %4914 = vmatprep.mubr.msk.bf16.mxu1 %vm5815_vm0, %v5814_v0 }
 0x518   : > { %4900 = vmatprep.subr.bf16.mxu1 %v5814_v0 }
 0x51b   : > { %4901 = vmatpush3.bf16.msra.mxu1 %v6202_v40 }
 0x51c   : > { %4902 = vmatprep.subr.bf16.mxu1 %v5814_v0 }
 0x51f   : > { %4903 = vmatpush3.bf16.msra.mxu1 %v6209_v43 }
 0x520   : > { %4904 = vmatprep.subr.bf16.mxu1 %v5814_v0 }
 0x523   : > { %4905 = vmatpush3.bf16.msra.mxu1 %v6216_v46 }
 0x524   : > { %4906 = vmatprep.subr.bf16.mxu1 %v5814_v0 }
 0x527   : > { %4907 = vmatpush3.bf16.msra.mxu1 %v6223_v49 }
 0x528   : > { %4908 = vmatprep.subr.bf16.mxu1 %v5814_v0 }
 0x52b   : > { %4909 = vmatpush3.bf16.msra.mxu1 %v6230_v52 }
 0x52c   : > { %4910 = vmatprep.subr.bf16.mxu1 %v5814_v0 }
 0x52f   : > { %4911 = vmatpush3.bf16.msra.mxu1 %v6240_v57 }
 0x530   : > { %4912 = vmatprep.subr.bf16.mxu1 %v5814_v0 }
 0x533   : > { %4913 = vmatpush3.bf16.msra.mxu1 %v6247_v61 }
 0x534   : > { %4946 = vmatprep.subr.bf16.mxu1 %v5814_v0 }
 0x536   : > { %4915 = vmatmul.mubr.bf16.vlgmr.msra.gmra.mrb[40].mxu1 %v2494_v42 }
 0x537   : > { %4950 = vmatprep.mubr.msk.bf16.mxu1 %vm5815_vm0, %v5814_v0  ;;  %4947 = vmatpush3.bf16.msra.mxu1 %v5527_v62 }
 0x538   : > { %4948 = vmatprep.subr.bf16.mxu1 %v5814_v0 }
 0x53b   : > { %4949 = vmatpush3.bf16.msra.mxu1 %v5528_v63 }
 0x53c   : > { %4954 = vmatprep.subr.bf16.mxu1 %v5814_v0 }
 0x5e9   : > { %v2487_v47 = vpop.f32.mrb[36].mxu1 }
 0x5ea   : > { %v2493_v48 = vadd.f32 %v2487_v47, %v2391_v31  ;;  %v4896_v50 = vpop.f32.mrb[37].mxu1 }
 0x5eb   : > { %v2490_v51 = vpop.f32.mrb[38].mxu1 }
 0x5ec   : > { %v4897_v53 = vpop.f32.mrb[39].mxu1 }
 0x609   : > { %v2529_v54 = vpop.f32.mrb[40].mxu1 }
 0x60a   : > { %v2535_v55 = vpack.c.bf16 %v2529_v54, %v2529_v54  ;;  %v4916_v56 = vpop.f32.mrb[41].mxu1  ;;  %v6460_v54 = vld [vmem:[%s6772_s3] sm:$0xff]  }
 0x60b   : > { %v2532_v58 = vpop.f32.mrb[42].mxu1 }
 0x60c   : > { %v4917_v59 = vpop.f32.mrb[43].mxu1  ;;  %4923 = vmatmul.mubr.msk.bf16.vlgmr.msra.gmra.mrb[32].mxu0 %vm898_vm1, %v2535_v55  ;;  %v6469_v55 = vld [vmem:[%s6772_s3 + $0x8] sm:$0xff]  }
 0x60d   : > { %4927 = vmatpush3.bf16.msra.mxu0 %v6193_v37  ;;  %4942 = vmatprep.mubr.msk.bf16.mxu0 %vm5815_vm0, %v5814_v0 }
 0x60e   : > { %4928 = vmatprep.subr.bf16.mxu0 %v5814_v0 }
 0x611   : > { %4929 = vmatpush3.bf16.msra.mxu0 %v6202_v40 }
 0x612   : > { %4930 = vmatprep.subr.bf16.mxu0 %v5814_v0 }
 0x615   : > { %4931 = vmatpush3.bf16.msra.mxu0 %v6209_v43 }
 0x616   : > { %4932 = vmatprep.subr.bf16.mxu0 %v5814_v0 }
 0x619   : > { %4933 = vmatpush3.bf16.msra.mxu0 %v6216_v46 }
 0x61a   : > { %4934 = vmatprep.subr.bf16.mxu0 %v5814_v0 }
 0x61d   : > { %4935 = vmatpush3.bf16.msra.mxu0 %v6223_v49 }
 0x61e   : > { %4936 = vmatprep.subr.bf16.mxu0 %v5814_v0 }
 0x621   : > { %4937 = vmatpush3.bf16.msra.mxu0 %v6230_v52 }
 0x622   : > { %4938 = vmatprep.subr.bf16.mxu0 %v5814_v0 }
 0x625   : > { %4939 = vmatpush3.bf16.msra.mxu0 %v6240_v57 }
 0x626   : > { %4940 = vmatprep.subr.bf16.mxu0 %v5814_v0 }
 0x629   : > { %4941 = vmatpush3.bf16.msra.mxu0 %v6247_v61 }
 0x62a   : > { %4974 = vmatprep.subr.bf16.mxu0 %v5814_v0 }
 0x62c   : > { %4943 = vmatmul.mubr.bf16.vlgmr.msra.gmra.mrb[36].mxu0 %v2596_v60 }
 0x62d   : > { %4978 = vmatprep.mubr.msk.bf16.mxu0 %vm5815_vm0, %v5814_v0  ;;  %4975 = vmatpush3.bf16.msra.mxu0 %v5529_v12 }
 0x62e   : > { %4976 = vmatprep.subr.bf16.mxu0 %v5814_v0 }
 0x631   : > { %4977 = vmatpush3.bf16.msra.mxu0 %v5530_v13 }
 0x632   : > { %4982 = vmatprep.subr.bf16.mxu0 %v5814_v0 }
 0x6df   : > { %v2589_v1 = vpop.f32.mrb[32].mxu0 }
 0x6e0   : > { %v2595_v2 = vadd.f32 %v2589_v1, %v2493_v48  ;;  %v4924_v3 = vpop.f32.mrb[33].mxu0 }
 0x6e1   : > { %v2592_v5 = vpop.f32.mrb[34].mxu0  ;;  %v6507_v3 = vld [vmem:[%s6772_s3 + $0x18] sm:$0xff]  }
 0x6e2   : > { %v4925_v6 = vpop.f32.mrb[35].mxu0  ;;  %v6514_v5 = vld [vmem:[%s6772_s3 + $0x20] sm:$0xff]  }
 0x6e3   : > { %v6521_v6 = vld [vmem:[%s6772_s3 + $0x28] sm:$0xff]  }
 0x6ff   : > { %v2631_v4 = vpop.f32.mrb[36].mxu0 }
 0x700   : > { %v2637_v7 = vpack.c.bf16 %v2631_v4, %v2631_v4  ;;  %v4944_v8 = vpop.f32.mrb[37].mxu0  ;;  %v6528_v4 = vld [vmem:[%s6772_s3 + $0x30] sm:$0xff]  }
 0x701   : > { %v2634_v9 = vpop.f32.mrb[38].mxu0  ;;  %v3106_v8 = vld [vmem:[%s6126_s16 + $0x2c] sm:$0xf] }
 0x702   : > { %v4945_v10 = vpop.f32.mrb[39].mxu0  ;;  %4951 = vmatmul.mubr.msk.bf16.vlgmr.msra.gmra.mrb[44].mxu1 %vm898_vm1, %v2637_v7  ;;  %v6535_v7 = vld [vmem:[%s6772_s3 + $0x38] sm:$0xff]  }
 0x703   : > { %4955 = vmatpush3.bf16.msra.mxu1 %v6193_v37  ;;  %4970 = vmatprep.mubr.msk.bf16.mxu1 %vm5815_vm0, %v5814_v0  ;;  %v5537_v9 = vld [vmem:[#allocation8 + $0xb0] sm:$0xff]   ;;  %v5538_v10 = vld [vmem:[#allocation8 + $0xb8] sm:$0xff]  }
 0x704   : > { %4956 = vmatprep.subr.bf16.mxu1 %v5814_v0 }
 0x707   : > { %4957 = vmatpush3.bf16.msra.mxu1 %v6202_v40 }
 0x708   : > { %4958 = vmatprep.subr.bf16.mxu1 %v5814_v0 }
 0x70b   : > { %4959 = vmatpush3.bf16.msra.mxu1 %v6209_v43 }
 0x70c   : > { %4960 = vmatprep.subr.bf16.mxu1 %v5814_v0 }
 0x70f   : > { %4961 = vmatpush3.bf16.msra.mxu1 %v6216_v46 }
 0x710   : > { %4962 = vmatprep.subr.bf16.mxu1 %v5814_v0 }
 0x713   : > { %4963 = vmatpush3.bf16.msra.mxu1 %v6223_v49 }
 0x714   : > { %4964 = vmatprep.subr.bf16.mxu1 %v5814_v0 }
 0x717   : > { %4965 = vmatpush3.bf16.msra.mxu1 %v6230_v52 }
 0x718   : > { %4966 = vmatprep.subr.bf16.mxu1 %v5814_v0 }
 0x71b   : > { %4967 = vmatpush3.bf16.msra.mxu1 %v6240_v57 }
 0x71c   : > { %4968 = vmatprep.subr.bf16.mxu1 %v5814_v0 }
 0x71f   : > { %4969 = vmatpush3.bf16.msra.mxu1 %v6247_v61 }
 0x720   : > { %5002 = vmatprep.subr.bf16.mxu1 %v5814_v0 }
 0x722   : > { %4971 = vmatmul.mubr.bf16.vlgmr.msra.gmra.mrb[48].mxu1 %v2698_v11 }
 0x723   : > { %5006 = vmatprep.mubr.msk.bf16.mxu1 %vm5815_vm0, %v5814_v0  ;;  %5003 = vmatpush3.bf16.msra.mxu1 %v5531_v25 }
 0x724   : > { %5004 = vmatprep.subr.bf16.mxu1 %v5814_v0 }
 0x727   : > { %5005 = vmatpush3.bf16.msra.mxu1 %v5532_v26 }
 0x728   : > { %5010 = vmatprep.subr.bf16.mxu1 %v5814_v0 }
 0x7d5   : > { %v2691_v14 = vpop.f32.mrb[44].mxu1 }
 0x7d6   : > { %v2697_v15 = vadd.f32 %v2691_v14, %v2595_v2  ;;  %v4952_v16 = vpop.f32.mrb[45].mxu1  ;;  %v6500_v2 = vld [vmem:[%s6772_s3 + $0x10] sm:$0xff]  }
 0x7d7   : > { %v2694_v17 = vpop.f32.mrb[46].mxu1 }
 0x7d8   : > { %v4953_v18 = vpop.f32.mrb[47].mxu1 }
 0x7f5   : > { %v2733_v19 = vpop.f32.mrb[48].mxu1 }
 0x7f6   : > { %v2739_v20 = vpack.c.bf16 %v2733_v19, %v2733_v19  ;;  %v4972_v21 = vpop.f32.mrb[49].mxu1 }
 0x7f7   : > { %v2736_v22 = vpop.f32.mrb[50].mxu1  ;;  %v3208_v21 = vld [vmem:[%s6126_s16 + $0x30] sm:$0xf] }
 0x7f8   : > { %v4973_v23 = vpop.f32.mrb[51].mxu1  ;;  %4979 = vmatmul.mubr.msk.bf16.vlgmr.msra.gmra.mrb[40].mxu0 %vm898_vm1, %v2739_v20  ;;  %v5539_v22 = vld [vmem:[#allocation8 + $0xc0] sm:$0xff]  }
 0x7f9   : > { %4983 = vmatpush3.bf16.msra.mxu0 %v6193_v37  ;;  %4998 = vmatprep.mubr.msk.bf16.mxu0 %vm5815_vm0, %v5814_v0  ;;  %v5540_v23 = vld [vmem:[#allocation8 + $0xc8] sm:$0xff]  }
 0x7fa   : > { %4984 = vmatprep.subr.bf16.mxu0 %v5814_v0 }
 0x7fd   : > { %4985 = vmatpush3.bf16.msra.mxu0 %v6202_v40 }
 0x7fe   : > { %4986 = vmatprep.subr.bf16.mxu0 %v5814_v0 }
 0x801   : > { %4987 = vmatpush3.bf16.msra.mxu0 %v6209_v43 }
 0x802   : > { %4988 = vmatprep.subr.bf16.mxu0 %v5814_v0 }
 0x805   : > { %4989 = vmatpush3.bf16.msra.mxu0 %v6216_v46 }
 0x806   : > { %4990 = vmatprep.subr.bf16.mxu0 %v5814_v0 }
 0x809   : > { %4991 = vmatpush3.bf16.msra.mxu0 %v6223_v49 }
 0x80a   : > { %4992 = vmatprep.subr.bf16.mxu0 %v5814_v0 }
 0x80d   : > { %4993 = vmatpush3.bf16.msra.mxu0 %v6230_v52 }
 0x80e   : > { %4994 = vmatprep.subr.bf16.mxu0 %v5814_v0 }
 0x811   : > { %4995 = vmatpush3.bf16.msra.mxu0 %v6240_v57 }
 0x812   : > { %4996 = vmatprep.subr.bf16.mxu0 %v5814_v0 }
 0x815   : > { %4997 = vmatpush3.bf16.msra.mxu0 %v6247_v61 }
 0x816   : > { %5030 = vmatprep.subr.bf16.mxu0 %v5814_v0 }
 0x818   : > { %4999 = vmatmul.mubr.bf16.vlgmr.msra.gmra.mrb[44].mxu0 %v2800_v24 }
 0x819   : > { %5034 = vmatprep.mubr.msk.bf16.mxu0 %vm5815_vm0, %v5814_v0 }
 0x8cb   : > { %v2793_v27 = vpop.f32.mrb[40].mxu0 }
 0x8cc   : > { %v2799_v28 = vadd.f32 %v2793_v27, %v2697_v15  ;;  %v4980_v29 = vpop.f32.mrb[41].mxu0 }
 0x8cd   : > { %v2796_v30 = vpop.f32.mrb[42].mxu0 }
 0x8ce   : > { %v4981_v31 = vpop.f32.mrb[43].mxu0 }
 0x8eb   : > { %v2835_v32 = vpop.f32.mrb[44].mxu0 }
 0x8ec   : > { %v2841_v33 = vpack.c.bf16 %v2835_v32, %v2835_v32  ;;  %v5000_v34 = vpop.f32.mrb[45].mxu0 }
 0x8ed   : > { %v2838_v35 = vpop.f32.mrb[46].mxu0  ;;  %v3310_v34 = vld [vmem:[%s6126_s16 + $0x34] sm:$0xf] }
 0x8ee   : > { %v5001_v36 = vpop.f32.mrb[47].mxu0  ;;  %5007 = vmatmul.mubr.msk.bf16.vlgmr.msra.gmra.mrb[52].mxu1 %vm898_vm1, %v2841_v33  ;;  %v5541_v35 = vld [vmem:[#allocation8 + $0xd0] sm:$0xff]  }
 0x8ef   : > { %5011 = vmatpush3.bf16.msra.mxu1 %v6193_v37  ;;  %5026 = vmatprep.mubr.msk.bf16.mxu1 %vm5815_vm0, %v5814_v0  ;;  %v2902_v37 = vld [vmem:[%s6126_s16 + $0x24] sm:$0xf] }
 0x8f0   : > { %5012 = vmatprep.subr.bf16.mxu1 %v5814_v0  ;;  %v5542_v36 = vld [vmem:[#allocation8 + $0xd8] sm:$0xff]  }
 0x8f3   : > { %5013 = vmatpush3.bf16.msra.mxu1 %v6202_v40  ;;  %v5533_v40 = vld [vmem:[#allocation8 + $0x90] sm:$0xff]  }
 0x8f4   : > { %5014 = vmatprep.subr.bf16.mxu1 %v5814_v0  ;;  %5031 = vmatpush3.bf16.msra.mxu0 %v5533_v40 }
 0x8f5   : > { %5032 = vmatprep.subr.bf16.mxu0 %v5814_v0 }
 0x8f7   : > { %5015 = vmatpush3.bf16.msra.mxu1 %v6209_v43 }
 0x8f8   : > { %5016 = vmatprep.subr.bf16.mxu1 %v5814_v0  ;;  %5033 = vmatpush3.bf16.msra.mxu0 %v5534_v38 }
 0x8f9   : > { %5038 = vmatprep.subr.bf16.mxu0 %v5814_v0 }
 0x8fb   : > { %5017 = vmatpush3.bf16.msra.mxu1 %v6216_v46 }
 0x8fc   : > { %5018 = vmatprep.subr.bf16.mxu1 %v5814_v0 }
 0x8ff   : > { %5019 = vmatpush3.bf16.msra.mxu1 %v6223_v49 }
 0x900   : > { %5020 = vmatprep.subr.bf16.mxu1 %v5814_v0 }
 0x903   : > { %5021 = vmatpush3.bf16.msra.mxu1 %v6230_v52 }
 0x904   : > { %5022 = vmatprep.subr.bf16.mxu1 %v5814_v0 }
 0x907   : > { %5023 = vmatpush3.bf16.msra.mxu1 %v6240_v57 }
 0x908   : > { %5024 = vmatprep.subr.bf16.mxu1 %v5814_v0 }
 0x90b   : > { %5025 = vmatpush3.bf16.msra.mxu1 %v6247_v61 }
 0x90c   : > { %5058 = vmatprep.subr.bf16.mxu1 %v5814_v0 }
 0x90e   : > { %5027 = vmatmul.mubr.bf16.vlgmr.msra.gmra.mrb[56].mxu1 %v2902_v37 }
 0x90f   : > { %5062 = vmatprep.mubr.msk.bf16.mxu1 %vm5815_vm0, %v5814_v0 }
 0x9c1   : > { %v2895_v39 = vpop.f32.mrb[52].mxu1 }
 0x9c2   : > { %v2901_v41 = vadd.f32 %v2895_v39, %v2799_v28  ;;  %v5008_v42 = vpop.f32.mrb[53].mxu1 }
 0x9c3   : > { %v2898_v44 = vpop.f32.mrb[54].mxu1 }
 0x9c4   : > { %v5009_v45 = vpop.f32.mrb[55].mxu1 }
 0x9e1   : > { %v2937_v47 = vpop.f32.mrb[56].mxu1 }
 0x9e2   : > { %v2943_v48 = vpack.c.bf16 %v2937_v47, %v2937_v47  ;;  %v5028_v50 = vpop.f32.mrb[57].mxu1 }
 0x9e3   : > { %v2940_v51 = vpop.f32.mrb[58].mxu1  ;;  %v3412_v50 = vld [vmem:[%s6126_s16 + $0x38] sm:$0xf] }
 0x9e4   : > { %v5029_v53 = vpop.f32.mrb[59].mxu1  ;;  %5035 = vmatmul.mubr.msk.bf16.vlgmr.msra.gmra.mrb[48].mxu0 %vm898_vm1, %v2943_v48  ;;  %v5543_v51 = vld [vmem:[#allocation8 + $0xe0] sm:$0xff]  }
 0x9e5   : > { %5039 = vmatpush3.bf16.msra.mxu0 %v6460_v54  ;;  %5054 = vmatprep.mubr.msk.bf16.mxu0 %vm5815_vm0, %v5814_v0  ;;  %v5544_v53 = vld [vmem:[#allocation8 + $0xe8] sm:$0xff]  }
 0x9e6   : > { %5040 = vmatprep.subr.bf16.mxu0 %v5814_v0 }
 0x9e9   : > { %5041 = vmatpush3.bf16.msra.mxu0 %v6469_v55 }
 0x9ea   : > { %5042 = vmatprep.subr.bf16.mxu0 %v5814_v0 }
 0x9ed   : > { %5043 = vmatpush3.bf16.msra.mxu0 %v6209_v43  ;;  %v3004_v43 = vld [vmem:[%s6126_s16 + $0x28] sm:$0xf] }
 0x9ee   : > { %5044 = vmatprep.subr.bf16.mxu0 %v5814_v0 }
 0x9f1   : > { %5045 = vmatpush3.bf16.msra.mxu0 %v6216_v46  ;;  %v5535_v46 = vld [vmem:[#allocation8 + $0xa0] sm:$0xff]  }
 0x9f2   : > { %5046 = vmatprep.subr.bf16.mxu0 %v5814_v0  ;;  %5059 = vmatpush3.bf16.msra.mxu1 %v5535_v46 }
 0x9f3   : > { %5060 = vmatprep.subr.bf16.mxu1 %v5814_v0 }
 0x9f5   : > { %5047 = vmatpush3.bf16.msra.mxu0 %v6223_v49  ;;  %v5536_v49 = vld [vmem:[#allocation8 + $0xa8] sm:$0xff]  }
 0x9f6   : > { %5048 = vmatprep.subr.bf16.mxu0 %v5814_v0  ;;  %5061 = vmatpush3.bf16.msra.mxu1 %v5536_v49 }
 0x9f7   : > { %5066 = vmatprep.subr.bf16.mxu1 %v5814_v0 }
 0x9f9   : > { %5049 = vmatpush3.bf16.msra.mxu0 %v6230_v52 }
 0x9fa   : > { %5050 = vmatprep.subr.bf16.mxu0 %v5814_v0 }
 0x9fd   : > { %5051 = vmatpush3.bf16.msra.mxu0 %v6240_v57 }
 0x9fe   : > { %5052 = vmatprep.subr.bf16.mxu0 %v5814_v0 }
 0xa01   : > { %5053 = vmatpush3.bf16.msra.mxu0 %v6247_v61 }
 0xa02   : > { %5086 = vmatprep.subr.bf16.mxu0 %v5814_v0 }
 0xa04   : > { %5055 = vmatmul.mubr.bf16.vlgmr.msra.gmra.mrb[52].mxu0 %v3004_v43 }
 0xa05   : > { %5090 = vmatprep.mubr.msk.bf16.mxu0 %vm5815_vm0, %v5814_v0  ;;  %5087 = vmatpush3.bf16.msra.mxu0 %v5537_v9 }
 0xa06   : > { %5088 = vmatprep.subr.bf16.mxu0 %v5814_v0 }
 0xa09   : > { %5089 = vmatpush3.bf16.msra.mxu0 %v5538_v10 }
 0xa0a   : > { %5094 = vmatprep.subr.bf16.mxu0 %v5814_v0 }
 0xab7   : > { %v2997_v52 = vpop.f32.mrb[48].mxu0 }
 0xab8   : > { %v3003_v57 = vadd.f32 %v2997_v52, %v2901_v41  ;;  %v5036_v56 = vpop.f32.mrb[49].mxu0 }
 0xab9   : > { %v3000_v58 = vpop.f32.mrb[50].mxu0 }
 0xaba   : > { %v5037_v61 = vpop.f32.mrb[51].mxu0 }
 0xad7   : > { %v3039_v59 = vpop.f32.mrb[52].mxu0 }
 0xad8   : > { %v3045_v60 = vpack.c.bf16 %v3039_v59, %v3039_v59  ;;  %v5056_v62 = vpop.f32.mrb[53].mxu0 }
 0xad9   : > { %v3042_v63 = vpop.f32.mrb[54].mxu0  ;;  %v3514_v62 = vld [vmem:[%s6126_s16 + $0x3c] sm:$0xf] }
 0xada   : > { %v5057_v1 = vpop.f32.mrb[55].mxu0  ;;  %5063 = vmatmul.mubr.msk.bf16.vlgmr.msra.gmra.mrb[60].mxu1 %vm898_vm1, %v3045_v60  ;;  %v5545_v63 = vld [vmem:[#allocation8 + $0xf0] sm:$0xff]  }
 0xadb   : > { %5067 = vmatpush3.bf16.msra.mxu1 %v6460_v54  ;;  %5082 = vmatprep.mubr.msk.bf16.mxu1 %vm5815_vm0, %v5814_v0  ;;  %v5546_v1 = vld [vmem:[#allocation8 + $0xf8] sm:$0xff]  }
 0xadc   : > { %5068 = vmatprep.subr.bf16.mxu1 %v5814_v0 }
 0xadf   : > { %5069 = vmatpush3.bf16.msra.mxu1 %v6469_v55 }
 0xae0   : > { %5070 = vmatprep.subr.bf16.mxu1 %v5814_v0 }
 0xae3   : > { %5071 = vmatpush3.bf16.msra.mxu1 %v6500_v2 }
 0xae4   : > { %5072 = vmatprep.subr.bf16.mxu1 %v5814_v0 }
 0xae7   : > { %5073 = vmatpush3.bf16.msra.mxu1 %v6507_v3 }
 0xae8   : > { %5074 = vmatprep.subr.bf16.mxu1 %v5814_v0 }
 0xaeb   : > { %5075 = vmatpush3.bf16.msra.mxu1 %v6514_v5 }
 0xaec   : > { %5076 = vmatprep.subr.bf16.mxu1 %v5814_v0 }
 0xaef   : > { %5077 = vmatpush3.bf16.msra.mxu1 %v6521_v6 }
 0xaf0   : > { %5078 = vmatprep.subr.bf16.mxu1 %v5814_v0 }
 0xaf3   : > { %5079 = vmatpush3.bf16.msra.mxu1 %v6528_v4 }
 0xaf4   : > { %5080 = vmatprep.subr.bf16.mxu1 %v5814_v0 }
 0xaf7   : > { %5081 = vmatpush3.bf16.msra.mxu1 %v6535_v7 }
 0xaf8   : > { %5114 = vmatprep.subr.bf16.mxu1 %v5814_v0 }
 0xafa   : > { %5083 = vmatmul.mubr.bf16.vlgmr.msra.gmra.mrb[64].mxu1 %v3106_v8 }
 0xafb   : > { %5118 = vmatprep.mubr.msk.bf16.mxu1 %vm5815_vm0, %v5814_v0  ;;  %5115 = vmatpush3.bf16.msra.mxu1 %v5539_v22 }
 0xafc   : > { %5116 = vmatprep.subr.bf16.mxu1 %v5814_v0 }
 0xaff   : > { %5117 = vmatpush3.bf16.msra.mxu1 %v5540_v23 }
 0xb00   : > { %5122 = vmatprep.subr.bf16.mxu1 %v5814_v0 }
 0xbad   : > { %v3099_v11 = vpop.f32.mrb[60].mxu1 }
 0xbae   : > { %v3105_v12 = vadd.f32 %v3099_v11, %v3003_v57  ;;  %v5064_v13 = vpop.f32.mrb[61].mxu1 }
 0xbaf   : > { %v3102_v14 = vpop.f32.mrb[62].mxu1 }
 0xbb0   : > { %v5065_v15 = vpop.f32.mrb[63].mxu1 }
 0xbcd   : > { %v3141_v16 = vpop.f32.mrb[64].mxu1 }
 0xbce   : > { %v3147_v17 = vpack.c.bf16 %v3141_v16, %v3141_v16  ;;  %v5084_v18 = vpop.f32.mrb[65].mxu1 }
 0xbcf   : > { %v3144_v19 = vpop.f32.mrb[66].mxu1 }
 0xbd0   : > { %v5085_v20 = vpop.f32.mrb[67].mxu1  ;;  %5091 = vmatmul.mubr.msk.bf16.vlgmr.msra.gmra.mrb[56].mxu0 %vm898_vm1, %v3147_v17 }
 0xbd1   : > { %5095 = vmatpush3.bf16.msra.mxu0 %v6460_v54  ;;  %5110 = vmatprep.mubr.msk.bf16.mxu0 %vm5815_vm0, %v5814_v0 }
 0xbd2   : > { %5096 = vmatprep.subr.bf16.mxu0 %v5814_v0 }
 0xbd5   : > { %5097 = vmatpush3.bf16.msra.mxu0 %v6469_v55 }
 0xbd6   : > { %5098 = vmatprep.subr.bf16.mxu0 %v5814_v0 }
 0xbd9   : > { %5099 = vmatpush3.bf16.msra.mxu0 %v6500_v2 }
 0xbda   : > { %5100 = vmatprep.subr.bf16.mxu0 %v5814_v0 }
 0xbdd   : > { %5101 = vmatpush3.bf16.msra.mxu0 %v6507_v3 }
 0xbde   : > { %5102 = vmatprep.subr.bf16.mxu0 %v5814_v0 }
 0xbe1   : > { %5103 = vmatpush3.bf16.msra.mxu0 %v6514_v5 }
 0xbe2   : > { %5104 = vmatprep.subr.bf16.mxu0 %v5814_v0 }
 0xbe5   : > { %5105 = vmatpush3.bf16.msra.mxu0 %v6521_v6 }
 0xbe6   : > { %5106 = vmatprep.subr.bf16.mxu0 %v5814_v0 }
 0xbe9   : > { %5107 = vmatpush3.bf16.msra.mxu0 %v6528_v4 }
 0xbea   : > { %5108 = vmatprep.subr.bf16.mxu0 %v5814_v0 }
 0xbed   : > { %5109 = vmatpush3.bf16.msra.mxu0 %v6535_v7 }
 0xbee   : > { %5142 = vmatprep.subr.bf16.mxu0 %v5814_v0 }
 0xbf0   : > { %5111 = vmatmul.mubr.bf16.vlgmr.msra.gmra.mrb[60].mxu0 %v3208_v21 }
 0xbf1   : > { %5146 = vmatprep.mubr.msk.bf16.mxu0 %vm5815_vm0, %v5814_v0  ;;  %5143 = vmatpush3.bf16.msra.mxu0 %v5541_v35 }
 0xbf2   : > { %5144 = vmatprep.subr.bf16.mxu0 %v5814_v0 }
 0xbf5   : > { %5145 = vmatpush3.bf16.msra.mxu0 %v5542_v36  ;;  %v5551_v36 = vld [vmem:[%s6777_s8 + $0x10] sm:$0xff]  }
 0xbf6   : > { %5150 = vmatprep.subr.bf16.mxu0 %v5814_v0 }
 0xca3   : > { %v3201_v24 = vpop.f32.mrb[56].mxu0 }
 0xca4   : > { %v3207_v25 = vadd.f32 %v3201_v24, %v3105_v12  ;;  %v5092_v26 = vpop.f32.mrb[57].mxu0  ;;  %v4334_v24 = vld [vmem:[%s6774_s5] ss:$0 sm:$0xff] }
 0xca5   : > { %v3204_v27 = vpop.f32.mrb[58].mxu0 }
 0xca6   : > { %v5093_v28 = vpop.f32.mrb[59].mxu0 }
 0xcc3   : > { %v3243_v29 = vpop.f32.mrb[60].mxu0 }
 0xcc4   : > { %v3249_v30 = vpack.c.bf16 %v3243_v29, %v3243_v29  ;;  %v5112_v31 = vpop.f32.mrb[61].mxu0 }
 0xcc5   : > { %v3246_v32 = vpop.f32.mrb[62].mxu0  ;;  %v5550_v31 = vld [vmem:[%s6777_s8 + $0x8] sm:$0xff]  }
 0xcc6   : > { %v5113_v33 = vpop.f32.mrb[63].mxu0  ;;  %5119 = vmatmul.mubr.msk.bf16.vlgmr.msra.gmra.mrb[68].mxu1 %vm898_vm1, %v3249_v30  ;;  %v5549_v30 = vld [vmem:[%s6777_s8] sm:$0xff]  }
 0xcc7   : > { %5123 = vmatpush3.bf16.msra.mxu1 %v6460_v54  ;;  %5138 = vmatprep.mubr.msk.bf16.mxu1 %vm5815_vm0, %v5814_v0 }
 0xcc8   : > { %5124 = vmatprep.subr.bf16.mxu1 %v5814_v0 }
 0xccb   : > { %5125 = vmatpush3.bf16.msra.mxu1 %v6469_v55 }
 0xccc   : > { %5126 = vmatprep.subr.bf16.mxu1 %v5814_v0 }
 0xccf   : > { %5127 = vmatpush3.bf16.msra.mxu1 %v6500_v2 }
 0xcd0   : > { %5128 = vmatprep.subr.bf16.mxu1 %v5814_v0 }
 0xcd3   : > { %5129 = vmatpush3.bf16.msra.mxu1 %v6507_v3 }
 0xcd4   : > { %5130 = vmatprep.subr.bf16.mxu1 %v5814_v0 }
 0xcd7   : > { %5131 = vmatpush3.bf16.msra.mxu1 %v6514_v5 }
 0xcd8   : > { %5132 = vmatprep.subr.bf16.mxu1 %v5814_v0 }
 0xcdb   : > { %5133 = vmatpush3.bf16.msra.mxu1 %v6521_v6 }
 0xcdc   : > { %5134 = vmatprep.subr.bf16.mxu1 %v5814_v0 }
 0xcdf   : > { %5135 = vmatpush3.bf16.msra.mxu1 %v6528_v4 }
 0xce0   : > { %5136 = vmatprep.subr.bf16.mxu1 %v5814_v0 }
 0xce3   : > { %5137 = vmatpush3.bf16.msra.mxu1 %v6535_v7 }
 0xce4   : > { %5170 = vmatprep.subr.bf16.mxu1 %v5814_v0 }
 0xce6   : > { %5139 = vmatmul.mubr.bf16.vlgmr.msra.gmra.mrb[72].mxu1 %v3310_v34 }
 0xce7   : > { %5174 = vmatprep.mubr.msk.bf16.mxu1 %vm5815_vm0, %v5814_v0  ;;  %5171 = vmatpush3.bf16.msra.mxu1 %v5543_v51 }
 0xce8   : > { %5172 = vmatprep.subr.bf16.mxu1 %v5814_v0 }
 0xceb   : > { %5173 = vmatpush3.bf16.msra.mxu1 %v5544_v53 }
 0xcec   : > { %5178 = vmatprep.subr.bf16.mxu1 %v5814_v0 }
 0xd99   : > { %v3303_v37 = vpop.f32.mrb[68].mxu1 }
 0xd9a   : > { %v3309_v40 = vadd.f32 %v3303_v37, %v3207_v25  ;;  %v5120_v38 = vpop.f32.mrb[69].mxu1  ;;  %v5552_v37 = vld [vmem:[%s6777_s8 + $0x18] sm:$0xff]  }
 0xd9b   : > { %v3306_v39 = vpop.f32.mrb[70].mxu1  ;;  %v5554_v38 = vld [vmem:[%s6777_s8 + $0x28] sm:$0xff]  }
 0xd9c   : > { %v5121_v41 = vpop.f32.mrb[71].mxu1  ;;  %v5555_v39 = vld [vmem:[%s6777_s8 + $0x30] sm:$0xff]  }
 0xd9d   : > { %v5556_v41 = vld [vmem:[%s6777_s8 + $0x38] sm:$0xff]  }
 0xdb9   : > { %v3345_v42 = vpop.f32.mrb[72].mxu1 }
 0xdba   : > { %v3351_v44 = vpack.c.bf16 %v3345_v42, %v3345_v42  ;;  %v5140_v45 = vpop.f32.mrb[73].mxu1  ;;  %v5557_v42 = vld [vmem:[#allocation10] sm:$0xff]  }
 0xdbb   : > { %v3348_v47 = vpop.f32.mrb[74].mxu1  ;;  %v5559_v45 = vld [vmem:[#allocation10 + $0x10] sm:$0xff]  }
 0xdbc   : > { %v5141_v48 = vpop.f32.mrb[75].mxu1  ;;  %5147 = vmatmul.mubr.msk.bf16.vlgmr.msra.gmra.mrb[64].mxu0 %vm898_vm1, %v3351_v44  ;;  %v5558_v44 = vld [vmem:[#allocation10 + $0x8] sm:$0xff]   ;;  %v5560_v47 = vld [vmem:[#allocation10 + $0x18] sm:$0xff]  }
 0xdbd   : > { %5151 = vmatpush3.bf16.msra.mxu0 %v6460_v54  ;;  %5166 = vmatprep.mubr.msk.bf16.mxu0 %vm5815_vm0, %v5814_v0  ;;  %v5561_v48 = vld [vmem:[#allocation10 + $0x20] sm:$0xff]  }
 0xdbe   : > { %5152 = vmatprep.subr.bf16.mxu0 %v5814_v0 }
 0xdc1   : > { %5153 = vmatpush3.bf16.msra.mxu0 %v6469_v55 }
 0xdc2   : > { %5154 = vmatprep.subr.bf16.mxu0 %v5814_v0 }
 0xdc5   : > { %5155 = vmatpush3.bf16.msra.mxu0 %v6500_v2 }
 0xdc6   : > { %5156 = vmatprep.subr.bf16.mxu0 %v5814_v0 }
 0xdc9   : > { %5157 = vmatpush3.bf16.msra.mxu0 %v6507_v3 }
 0xdca   : > { %5158 = vmatprep.subr.bf16.mxu0 %v5814_v0 }
 0xdcd   : > { %5159 = vmatpush3.bf16.msra.mxu0 %v6514_v5 }
 0xdce   : > { %5160 = vmatprep.subr.bf16.mxu0 %v5814_v0 }
 0xdd1   : > { %5161 = vmatpush3.bf16.msra.mxu0 %v6521_v6 }
 0xdd2   : > { %5162 = vmatprep.subr.bf16.mxu0 %v5814_v0 }
 0xdd5   : > { %5163 = vmatpush3.bf16.msra.mxu0 %v6528_v4 }
 0xdd6   : > { %5164 = vmatprep.subr.bf16.mxu0 %v5814_v0 }
 0xdd9   : > { %5165 = vmatpush3.bf16.msra.mxu0 %v6535_v7 }
 0xdda   : > { %5198 = vmatprep.subr.bf16.mxu0 %v5814_v0 }
 0xddc   : > { %5167 = vmatmul.mubr.bf16.vlgmr.msra.gmra.mrb[68].mxu0 %v3412_v50  ;;  %v5562_v50 = vld [vmem:[#allocation10 + $0x28] sm:$0xff]  }
 0xddd   : > { %5202 = vmatprep.mubr.msk.bf16.mxu0 %vm5815_vm0, %v5814_v0  ;;  %5199 = vmatpush3.bf16.msra.mxu0 %v5545_v63 }
 0xdde   : > { %5200 = vmatprep.subr.bf16.mxu0 %v5814_v0 }
 0xde1   : > { %5201 = vmatpush3.bf16.msra.mxu0 %v5546_v1 }
 0xde2   : > { %5206 = vmatprep.subr.bf16.mxu0 %v5814_v0 }
 0xe8f   : > { %v3405_v43 = vpop.f32.mrb[64].mxu0 }
 0xe90   : > { %v3411_v46 = vadd.f32 %v3405_v43, %v3309_v40  ;;  %v5148_v49 = vpop.f32.mrb[65].mxu0  ;;  %v5553_v40 = vld [vmem:[%s6777_s8 + $0x20] sm:$0xff]  }
 0xe91   : > { %v3408_v52 = vpop.f32.mrb[66].mxu0  ;;  %v4335_v49 = vld [vmem:[%s6775_s6] ss:$0 sm:$0xff] }
 0xe92   : > { %v5149_v57 = vpop.f32.mrb[67].mxu0 }
 0xe93   : > { %v4336_v57 = vld [vmem:[%s6814_s20] ss:$0 sm:$0xff]  ;;  %s5816_s20 = smov [#allocation11]  }
 0xe94   : > { %s5731_s26 = sshll.u32 %s5816_s20, 4  ;;  %s5732_s26 = int_to_ptr.vmem [resolvable:$false] %s5731_s26 }
 0xe95   : > { %s5733_s0 = scalar_lea.vmem %s5732_s26, 256 }
 0xeaf   : > { %v3447_v56 = vpop.f32.mrb[68].mxu0 }
 0xeb0   : > { %v3453_v58 = vpack.c.bf16 %v3447_v56, %v3447_v56  ;;  %v5168_v61 = vpop.f32.mrb[69].mxu0 }
 0xeb1   : > { %v3450_v59 = vpop.f32.mrb[70].mxu0 }
 0xeb2   : > { %v5169_v60 = vpop.f32.mrb[71].mxu0  ;;  %5175 = vmatmul.mubr.msk.bf16.vlgmr.msra.gmra.mrb[76].mxu1 %vm898_vm1, %v3453_v58  ;;  %v5563_v59 = vld [vmem:[#allocation10 + $0x30] sm:$0xff]  }
 0xeb3   : > { %5179 = vmatpush3.bf16.msra.mxu1 %v6460_v54  ;;  %5194 = vmatprep.mubr.msk.bf16.mxu1 %vm5815_vm0, %v5814_v0  ;;  %v5564_v60 = vld [vmem:[#allocation10 + $0x38] sm:$0xff]  }
 0xeb4   : > { %5180 = vmatprep.subr.bf16.mxu1 %v5814_v0 }
 0xeb7   : > { %5181 = vmatpush3.bf16.msra.mxu1 %v6469_v55 }
 0xeb8   : > { %5182 = vmatprep.subr.bf16.mxu1 %v5814_v0 }
 0xebb   : > { %5183 = vmatpush3.bf16.msra.mxu1 %v6500_v2 }
 0xebc   : > { %5184 = vmatprep.subr.bf16.mxu1 %v5814_v0 }
 0xebf   : > { %5185 = vmatpush3.bf16.msra.mxu1 %v6507_v3 }
 0xec0   : > { %5186 = vmatprep.subr.bf16.mxu1 %v5814_v0 }
 0xec3   : > { %5187 = vmatpush3.bf16.msra.mxu1 %v6514_v5 }
 0xec4   : > { %5188 = vmatprep.subr.bf16.mxu1 %v5814_v0 }
 0xec7   : > { %5189 = vmatpush3.bf16.msra.mxu1 %v6521_v6 }
 0xec8   : > { %5190 = vmatprep.subr.bf16.mxu1 %v5814_v0 }
 0xecb   : > { %5191 = vmatpush3.bf16.msra.mxu1 %v6528_v4 }
 0xecc   : > { %5192 = vmatprep.subr.bf16.mxu1 %v5814_v0 }
 0xecf   : > { %5193 = vmatpush3.bf16.msra.mxu1 %v6535_v7 }
 0xed0   : > { %5226 = vmatprep.subr.bf16.mxu1 %v5814_v0 }
 0xed2   : > { %5195 = vmatmul.mubr.bf16.vlgmr.msra.gmra.mrb[80].mxu1 %v3514_v62  ;;  %v4337_v62 = vld [vmem:[%s6815_s29] ss:$0 sm:$0xff] }
 0xed3   : > { %5230 = vmatprep.mubr.msk.bf16.mxu1 %vm5815_vm0, %v5814_v0 }
 0xf85   : > { %v3507_v8 = vpop.f32.mrb[76].mxu1 }
 0xf86   : > { %v3513_v9 = vadd.f32 %v3507_v8, %v3411_v46  ;;  %v5176_v10 = vpop.f32.mrb[77].mxu1 }
 0xf87   : > { %v3510_v11 = vpop.f32.mrb[78].mxu1 }
 0xf88   : > { %v5177_v12 = vpop.f32.mrb[79].mxu1 }
 0xfa5   : > { %v3549_v13 = vpop.f32.mrb[80].mxu1 }
 0xfa6   : > { %v3555_v14 = vpack.c.bf16 %v3549_v13, %v3549_v13  ;;  %v5196_v15 = vpop.f32.mrb[81].mxu1 }
 0xfa7   : > { %v3552_v16 = vpop.f32.mrb[82].mxu1 }
 0xfa8   : > { %v5197_v17 = vpop.f32.mrb[83].mxu1  ;;  %5203 = vmatmul.mubr.msk.bf16.vlgmr.msra.gmra.mrb[72].mxu0 %vm898_vm1, %v3555_v14 }
 0xfa9   : > { %5207 = vmatpush3.bf16.msra.mxu0 %v6460_v54  ;;  %5222 = vmatprep.mubr.msk.bf16.mxu0 %vm5815_vm0, %v5814_v0  ;;  %v3616_v54 = vld [vmem:[%s6126_s16 + $0x40] sm:$0xf]  ;;  %s3994_s16 = sshll.u32 %s510_s15, 4  ;;  %s6727_s16 = int_to_ptr.vmem [resolvable:$true] %s3994_s16 }
 0xfaa   : > { %5208 = vmatprep.subr.bf16.mxu0 %v5814_v0  ;;  %s5727_s25 = scalar_lea.vmem %s6727_s16, 128  ;;  %p5734_p0 = scmp.lt.s32.totalorder %s6727_s16, %s5732_s26 }
 0xfab   : > { %p5728_p12 = scmp.ne.s32.totalorder %s6727_s16, %s5727_s25  ;;  %p5735_p8 = scmp.lt.s32.totalorder %s5733_s0, %s5727_s25 }
 0xfad   : > { %5209 = vmatpush3.bf16.msra.mxu0 %v6469_v55  ;;  %v5547_v55 = vld [vmem:[#allocation8 + $0x100] sm:$0xff]   ;;  %p5729_p2 = pnand %p5728_p12, %p6818_p1  ;;  %p5736_p6 = por %p5735_p8, %p5734_p0 }
 0xfae   : > { %5210 = vmatprep.subr.bf16.mxu0 %v5814_v0  ;;  %5227 = vmatpush3.bf16.msra.mxu1 %v5547_v55 }
 0xfaf   : > { %5228 = vmatprep.subr.bf16.mxu1 %v5814_v0  ;;  %p5730_p4 = pneg %p5729_p2 }
 0xfb1   : > { %5211 = vmatpush3.bf16.msra.mxu0 %v6500_v2  ;;  %v5548_v2 = vld [vmem:[#allocation8 + $0x108] sm:$0xff]   ;;  %p5737_p10 = pnand %p5736_p6, %p5730_p4 }
 0xfb2   : > { %5212 = vmatprep.subr.bf16.mxu0 %v5814_v0  ;;  %5229 = vmatpush3.bf16.msra.mxu1 %v5548_v2 }
 0xfb3   : > { %5234 = vmatprep.subr.bf16.mxu1 %v5814_v0 }
 0xfb5   : > { %5213 = vmatpush3.bf16.msra.mxu0 %v6507_v3 }
 0xfb6   : > { %5214 = vmatprep.subr.bf16.mxu0 %v5814_v0 }
 0xfb9   : > { %5215 = vmatpush3.bf16.msra.mxu0 %v6514_v5 }
 0xfba   : > { %5216 = vmatprep.subr.bf16.mxu0 %v5814_v0 }
 0xfbd   : > { %5217 = vmatpush3.bf16.msra.mxu0 %v6521_v6 }
 0xfbe   : > { %5218 = vmatprep.subr.bf16.mxu0 %v5814_v0 }
 0xfc1   : > { %5219 = vmatpush3.bf16.msra.mxu0 %v6528_v4 }
 0xfc2   : > { %5220 = vmatprep.subr.bf16.mxu0 %v5814_v0 }
 0xfc5   : > { %5221 = vmatpush3.bf16.msra.mxu0 %v6535_v7 }
 0xfc6   : > { %5254 = vmatprep.subr.bf16.mxu0 %v5814_v0 }
 0xfc8   : > { %5223 = vmatmul.mubr.bf16.vlgmr.msra.gmra.mrb[76].mxu0 %v3616_v54 }
 0xfc9   : > { %5270 = vmatprep.mubr.msk.bf16.mxu0 %vm5815_vm0, %v5814_v0  ;;  %5255 = vmatpush3.bf16.msra.mxu0 %v5557_v42 }
 0xfca   : > { %5256 = vmatprep.subr.bf16.mxu0 %v5814_v0 }
 0xfcd   : > { %5257 = vmatpush3.bf16.msra.mxu0 %v5558_v44 }
 0xfce   : > { %5258 = vmatprep.subr.bf16.mxu0 %v5814_v0 }
 0xfd1   : > { %5259 = vmatpush3.bf16.msra.mxu0 %v5559_v45 }
 0xfd2   : > { %5260 = vmatprep.subr.bf16.mxu0 %v5814_v0 }
 0xfd5   : > { %5261 = vmatpush3.bf16.msra.mxu0 %v5560_v47 }
 0xfd6   : > { %5262 = vmatprep.subr.bf16.mxu0 %v5814_v0 }
 0xfd9   : > { %5263 = vmatpush3.bf16.msra.mxu0 %v5561_v48 }
 0xfda   : > { %5264 = vmatprep.subr.bf16.mxu0 %v5814_v0 }
 0xfdd   : > { %5265 = vmatpush3.bf16.msra.mxu0 %v5562_v50 }
 0xfde   : > { %5266 = vmatprep.subr.bf16.mxu0 %v5814_v0 }
 0xfe1   : > { %5267 = vmatpush3.bf16.msra.mxu0 %v5563_v59 }
 0xfe2   : > { %5268 = vmatprep.subr.bf16.mxu0 %v5814_v0 }
 0xfe5   : > { %5269 = vmatpush3.bf16.msra.mxu0 %v5564_v60 }
0x107b   : > { %v3609_v3 = vpop.f32.mrb[72].mxu0 }
0x107c   : > { %v3615_v5 = vadd.f32 %v3609_v3, %v3513_v9  ;;  %v5204_v6 = vpop.f32.mrb[73].mxu0 }
0x107d   : > { %v3612_v4 = vpop.f32.mrb[74].mxu0 }
0x107e   : > { %v5205_v7 = vpop.f32.mrb[75].mxu0 }
0x109b   : > { %v3651_v18 = vpop.f32.mrb[76].mxu0 }
0x109c   : > { %v3657_v19 = vpack.c.bf16 %v3651_v18, %v3651_v18  ;;  %v5224_v20 = vpop.f32.mrb[77].mxu0 }
0x109d   : > { %v3654_v21 = vpop.f32.mrb[78].mxu0 }
0x109e   : > { %v5225_v22 = vpop.f32.mrb[79].mxu0  ;;  %5231 = vmatmul.mubr.msk.bf16.vlgmr.msra.gmra.mrb[84].mxu1 %vm898_vm1, %v3657_v19 }
0x109f   : > { %5250 = vmatprep.mubr.msk.bf16.mxu1 %vm5815_vm0, %v5814_v0  ;;  %5235 = vmatpush3.bf16.msra.mxu1 %v5549_v30 }
0x10a0   : > { %5236 = vmatprep.subr.bf16.mxu1 %v5814_v0 }
0x10a3   : > { %5237 = vmatpush3.bf16.msra.mxu1 %v5550_v31 }
0x10a4   : > { %5238 = vmatprep.subr.bf16.mxu1 %v5814_v0 }
0x10a7   : > { %5239 = vmatpush3.bf16.msra.mxu1 %v5551_v36 }
0x10a8   : > { %5240 = vmatprep.subr.bf16.mxu1 %v5814_v0 }
0x10ab   : > { %5241 = vmatpush3.bf16.msra.mxu1 %v5552_v37 }
0x10ac   : > { %5242 = vmatprep.subr.bf16.mxu1 %v5814_v0 }
0x10af   : > { %5243 = vmatpush3.bf16.msra.mxu1 %v5553_v40 }
0x10b0   : > { %5244 = vmatprep.subr.bf16.mxu1 %v5814_v0 }
0x10b3   : > { %5245 = vmatpush3.bf16.msra.mxu1 %v5554_v38 }
0x10b4   : > { %5246 = vmatprep.subr.bf16.mxu1 %v5814_v0 }
0x10b7   : > { %5247 = vmatpush3.bf16.msra.mxu1 %v5555_v39 }
0x10b8   : > { %5248 = vmatprep.subr.bf16.mxu1 %v5814_v0  ;;  %v4346_v0 = vld [vmem:[%s6816_s28] ss:$0 sm:$0xff] }
0x10bb   : > { %5249 = vmatpush3.bf16.msra.mxu1 %v5556_v41 }
0x1171   : > { %v3711_v23 = vpop.f32.mrb[84].mxu1 }
0x1172   : > { %v3717_v25 = vadd.f32 %v3711_v23, %v3615_v5  ;;  %v5232_v26 = vpop.f32.mrb[85].mxu1 }
0x1173   : > { %v3714_v27 = vpop.f32.mrb[86].mxu1 }
0x1174   : > { %v5233_v28 = vpop.f32.mrb[87].mxu1  ;;  %v3725_v29 = vadd.f32 %v4334_v24, %v3717_v25 }
0x1176   : > { %3726 = vadd.xlane.f32.xlu0 %v3725_v29 }
0x1203   : > { %v3727_v32 = vpop.xlane.xlu0 %3726 }
0x1204   : > { %v3729_v33 = vmul.f32 0.0078125, %v3727_v32 }
0x1206   : > { %v3730_v34 = vsub.f32 %v3725_v29, %v3729_v33 }
0x1208   : > { %v3731_v35 = vmul.f32 %v3730_v34, %v3730_v34 }
0x120a   : > { %3732 = vadd.xlane.f32.xlu0 %v3731_v35 }
0x1297   : > { %v3733_v51 = vpop.xlane.xlu0 %3732 }
0x1298   : > { %v3734_v53 = vmul.f32 0.0078125, %v3733_v51 }
0x129a   : > { %v3735_v43 = vadd.f32 1e-05, %v3734_v53 }
0x129c   : > { %5565 = vrsqrt.f32 %v3735_v43 }
0x12a6   : > { %v5566_v46 = vpop.eup %5565 }
0x12a7   : > { %v3737_v52 = vmul.f32 %v5566_v46, %v3730_v34 }
0x12a9   : > { %v3745_v56 = vmul.f32 %v4335_v49, %v3737_v52 }
0x12ab   : > { %v3753_v58 = vadd.f32 %v4336_v57, %v3745_v56 }
0x12ad   : > { %v3754_v61 = vpack.c.bf16 %v3753_v58, %v3753_v58 }
0x12af   : > { %5251 = vmatmul.mubr.bf16.vlgmr.msra.gmra.mrb[88].mxu1 %v3754_v61 }
0x1382   : > { %v3860_v63 = vpop.f32.mrb[88].mxu1 }
0x1383   : > { %v3861_v1 = vadd.f32 %v4337_v62, %v3860_v63  ;;  %v5252_v8 = vpop.f32.mrb[89].mxu1 }
0x1384   : > { %v3863_v9 = vpop.f32.mrb[90].mxu1 }
0x1385   : > { %v3866_v10 = vmax.f32 %v3861_v1, 0.0  ;;  %v5253_v11 = vpop.f32.mrb[91].mxu1 }
0x1387   : > { %v3867_v12 = vpack.c.bf16 %v3866_v10, %v3866_v10 }
0x1389   : > { %5271 = vmatmul.mubr.bf16.vlgmr.msra.gmra.mrb[80].mxu0 %v3867_v12 }
0x145c   : > { %v3973_v13 = vpop.f32.mrb[80].mxu0 }
0x145d   : > { %v3974_v14 = vadd.f32 %v4346_v0, %v3973_v13  ;;  %v5272_v15 = vpop.f32.mrb[81].mxu0 }
0x145e   : > { %v3976_v16 = vpop.f32.mrb[82].mxu0 }
0x145f   : > { %3979 = vst [vmem:[%s510_s15] sm:$0xff] %v3974_v14  ;;  %v5273_v17 = vpop.f32.mrb[83].mxu0 }
0x1460   : > { %5740 = shalt.err (!%p5737_p10)
}
0x1461   : > { %s5741_s2 = scalar_lea.hbm %s6725_s9, 128  ;;  %s5745_s27 = scalar_lea.hbm %s6817_s30, 256 }
0x1462   : > { %p5742_p13 = scmp.ne.s32.totalorder %s6725_s9, %s5741_s2  ;;  %p5746_p9 = scmp.lt.u32.totalorder %s6725_s9, %s6817_s30 }
0x1463   : > { %p5747_p3 = scmp.lt.u32.totalorder %s5745_s27, %s5741_s2  ;;  %p5749_p12 = scmp.lt.u32.totalorder %s5741_s2, %s6725_s9 }
0x1464   : > { %p5743_p5 = pnand %p5742_p13, %p6818_p1 }
0x1465   : > { %p5748_p7 = por %p5747_p3, %p5746_p9 }
0x1466   : > { %p5744_p11 = pneg %p5743_p5 }
0x1467   : > { %p5750_p2 = por %p5749_p12, %p5748_p7 }
0x1469   : > { %p5751_p4 = pnand %p5750_p2, %p5744_p11 }
0x146b   : > { %5754 = shalt.err (!%p5751_p4)
}
0x146c   : > { %5293 = dma.vmem_to_hbm [thread:$0]  (%p6818_p1), %s6727_s16, 128, %s6725_s9, %s3981_s17  }
0x146d PF: > { %s6819_s7 = sld [smem:[#allocation17_spill]]  ;;  %s6820_s15 = sld [smem:[#allocation18_spill]] }
0x146e   : > { %p6822_p8 = scmp.ge.s32.totalorder %s5805_s24, 2 }
0x1473   : > { %s4006_s19 = sand.u32 1, %s6819_s7   ;;  %p6821_p0 = scmp.ne.s32.totalorder %s6820_s15, 0 }
0x1474   : > { %s4007_s14 = scalar_lea.sflag [#allocation4], %s4006_s19 }
0x1475   : > { %p5313_p6 = pnand %p6822_p8, %p6821_p0 }
0x1477   : > { %5788 = dma.done.wait (!%p5313_p6), %s4007_s14, 128  }
0x1478   : > { %5790 = vsyncadd (!%p5313_p6), %s4007_s14, 4294967168  ;;  %s6823_s25 = smov %s6022_s21  ;;  %p29_p10 = scmp.ge.s32.totalorder %s6022_s21, 4  }
0x1479   : > { %s6824_s21 = smov %s5797_s22  ;;  %s6825_s22 = smov %s5801_s23 }
0x147a   : > { %s6826_s23 = smov %s6032_s11  ;;  %s6827_s24 = smov %s6823_s25 }
0x147b   :  { %31 = sbr.rel (!%p29_p10) target bundleno = 15 (0xf), region = 138 }
0x1482   :  { %4012 = vsyncpa [#allocation3], 1 }
0x1483   :  { %4014 = vsyncpa [#allocation3 + $0x1], 1 }
0x1484   :  { %4015 = vsyncpa [#allocation6], 1 }
0x1485   :  { %4017 = vsyncpa [#allocation6 + $0x1], 1 }
0x1486   :  { %4018 = vsyncpa [#allocation9], 1 }
0x1487   :  { %4019 = vsyncpa [#allocation4], 1 }
0x1488   :  { %4021 = vsyncpa [#allocation4 + $0x1], 1 }

</bundles_post_ra>
